<compile_context>
chip_gen: v7x
topology: tpu7x:2x2x1
jax: 0.10.0
libtpu: 0.0.40
codegen_flags: <defaults>
</compile_context>

<pallas_src>
import functools

import jax
import jax.numpy as jnp
from jax.experimental import pallas as pl
from jax.experimental.pallas import tpu as pltpu


def fused_encoder_kernel(x_ref, maskb_ref,
                         wq_ref, bq_ref, wk_ref, bk_ref, wv_ref, bv_ref,
                         wo_ref, bo_ref,
                         ln1_g_ref, ln1_b_ref,
                         w1_ref, b1_ref, w2_ref, b2_ref,
                         ln2_g_ref, ln2_b_ref,
                         out_ref, act_ref, *, n_heads, head_dim):
    layer = pl.program_id(1)
    n_layers = pl.num_programs(1)

    # Load the embedded input once per batch (layer axis keeps the activation resident).
    @pl.when(layer == 0)
    def _():
        act_ref[...] = x_ref[0]

    x = act_ref[...]                           # [S, H] float32
    S, H = x.shape
    xb = x.astype(jnp.bfloat16)
    # Hoisted broadcast, reused by the three QKV contractions.
    x_heads = jnp.broadcast_to(xb[None], (n_heads, S, H))     # [nH, S, H] bf16

    # --- multi-head self attention (head-major batched contractions) ---------------
    q = jnp.einsum('nsh,nhd->nsd', x_heads, wq_ref[0],
                   preferred_element_type=jnp.float32) + bq_ref[0]   # [nH, S, hd] f32
    k = jnp.einsum('nsh,nhd->nsd', x_heads, wk_ref[0],
                   preferred_element_type=jnp.float32) + bk_ref[0]
    v = jnp.einsum('nsh,nhd->nsd', x_heads, wv_ref[0],
                   preferred_element_type=jnp.float32) + bv_ref[0]

    inv_scale = jnp.float32(1.0 / (float(head_dim) ** 0.5))
    energy = jnp.einsum('nsd,ntd->nst',
                        q.astype(jnp.bfloat16), k.astype(jnp.bfloat16),
                        preferred_element_type=jnp.float32) * inv_scale   # [nH, S, S]
    energy = energy + maskb_ref[0]          # [1, S] additive key-padding bias (0 / -1e10)

    # softmax in f32
    m = jnp.max(energy, axis=-1, keepdims=True)
    p = jnp.exp(energy - m)
    denom = jnp.sum(p, axis=-1, keepdims=True)
    attn = p * pl.reciprocal(denom, approx=True)

    av = jnp.einsum('nst,ntd->nsd',
                    attn.astype(jnp.bfloat16), v.astype(jnp.bfloat16),
                    preferred_element_type=jnp.float32)                   # [nH, S, hd]
    proj = jnp.einsum('nsd,ndh->nsh',
                      av.astype(jnp.bfloat16), wo_ref[0],
                      preferred_element_type=jnp.float32)                 # [nH, S, H]
    attn_out = jnp.sum(proj, axis=0) + bo_ref[0]                          # [S, H]

    # --- residual + layernorm 1 (f32) ------------------------------------------------
    y = x + attn_out
    mu = jnp.mean(y, axis=-1, keepdims=True)
    var = jnp.mean((y - mu) ** 2, axis=-1, keepdims=True)
    y = (y - mu) * jax.lax.rsqrt(var + 1e-5) * ln1_g_ref[0] + ln1_b_ref[0]

    # --- position-wise feed forward (bf16 matmuls, f32 accumulate) --------------------
    h1 = jnp.dot(y.astype(jnp.bfloat16), w1_ref[0],
                 preferred_element_type=jnp.float32) + b1_ref[0]
    h1 = jnp.maximum(h1, 0.0)
    h2 = jnp.dot(h1.astype(jnp.bfloat16), w2_ref[0],
                 preferred_element_type=jnp.float32) + b2_ref[0]

    # --- residual + layernorm 2 (f32) ------------------------------------------------
    z = y + h2
    mu2 = jnp.mean(z, axis=-1, keepdims=True)
    var2 = jnp.mean((z - mu2) ** 2, axis=-1, keepdims=True)
    z = (z - mu2) * jax.lax.rsqrt(var2 + 1e-5) * ln2_g_ref[0] + ln2_b_ref[0]

    act_ref[...] = z                          # carry to next layer (stays in VMEM)

    @pl.when(layer == n_layers - 1)
    def _():
        out_ref[0] = z                        # single HBM writeback per batch


def encoder_layers_fused(x, mask_bias, packed, n_heads):
    """x: [B, S, H] f32, mask_bias: [B, 1, S] f32 additive -> [B, S, H] f32."""
    B, S, H = x.shape
    head_dim = H // n_heads

    names = ("wq", "bq", "wk", "bk", "wv", "bv", "wo", "bo",
             "ln1_g", "ln1_b", "w1", "b1", "w2", "b2", "ln2_g", "ln2_b")
    weights = [packed[n] for n in names]
    n_layers = packed["wq"].shape[0]

    def wspec(arr):
        blk = (1,) + arr.shape[1:]
        nd_rest = arr.ndim - 1
        return pl.BlockSpec(blk, lambda b, l, _n=nd_rest: (l,) + (0,) * _n)

    in_specs = [pl.BlockSpec((1, S, H), lambda b, l: (b, 0, 0)),
                pl.BlockSpec((1, 1, S), lambda b, l: (b, 0, 0))]
    in_specs += [wspec(w) for w in weights]

    kernel = functools.partial(fused_encoder_kernel, n_heads=n_heads, head_dim=head_dim)
    return pl.pallas_call(
        kernel,
        out_shape=jax.ShapeDtypeStruct((B, S, H), jnp.float32),
        grid=(B, n_layers),
        in_specs=in_specs,
        out_specs=pl.BlockSpec((1, S, H), lambda b, l: (b, 0, 0)),
        scratch_shapes=[pltpu.VMEM((S, H), jnp.float32)],
        compiler_params=pltpu.CompilerParams(
            dimension_semantics=("parallel", "arbitrary"),
            vmem_limit_bytes=48 * 1024 * 1024),
    )(x, mask_bias, *weights)


def init_params(key, input_dim, hidden_dim, n_layers, n_heads, ff_dim, max_length):
    head_dim = hidden_dim // n_heads
    k_tok, k_pos, k_layers = jax.random.split(key, 3)
    lkeys = jax.random.split(k_layers, n_layers)
    s_h = 1.0 / float(hidden_dim) ** 0.5
    s_f = 1.0 / float(ff_dim) ** 0.5

    def split_heads(w):  # (H, H) -> (nH, H, hd), head-major
        return w.reshape(hidden_dim, n_heads, head_dim).transpose(1, 0, 2)

    layers = []
    for li in range(n_layers):
        lk = jax.random.split(lkeys[li], 6)
        wq = jax.random.normal(lk[0], (hidden_dim, hidden_dim), jnp.float32) * s_h
        wk = jax.random.normal(lk[1], (hidden_dim, hidden_dim), jnp.float32) * s_h
        wv = jax.random.normal(lk[2], (hidden_dim, hidden_dim), jnp.float32) * s_h
        wo = jax.random.normal(lk[3], (hidden_dim, hidden_dim), jnp.float32) * s_h
        w1 = jax.random.normal(lk[4], (hidden_dim, ff_dim), jnp.float32) * s_h
        w2 = jax.random.normal(lk[5], (ff_dim, hidden_dim), jnp.float32) * s_f
        layers.append({
            "wq": split_heads(wq).astype(jnp.bfloat16),
            "bq": jnp.zeros((n_heads, 1, head_dim), jnp.float32),
            "wk": split_heads(wk).astype(jnp.bfloat16),
            "bk": jnp.zeros((n_heads, 1, head_dim), jnp.float32),
            "wv": split_heads(wv).astype(jnp.bfloat16),
            "bv": jnp.zeros((n_heads, 1, head_dim), jnp.float32),
            "wo": wo.reshape(n_heads, head_dim, hidden_dim).astype(jnp.bfloat16),
            "bo": jnp.zeros((1, hidden_dim), jnp.float32),
            "ln1_g": jnp.ones((1, hidden_dim), jnp.float32),
            "ln1_b": jnp.zeros((1, hidden_dim), jnp.float32),
            "w1": w1.astype(jnp.bfloat16),
            "b1": jnp.zeros((1, ff_dim), jnp.float32),
            "w2": w2.astype(jnp.bfloat16),
            "b2": jnp.zeros((1, hidden_dim), jnp.float32),
            "ln2_g": jnp.ones((1, hidden_dim), jnp.float32),
            "ln2_b": jnp.zeros((1, hidden_dim), jnp.float32),
        })
    # Stack per-layer params with a leading layer axis for the fused (batch, layer) grid.
    packed = {k: jnp.stack([ly[k] for ly in layers], axis=0) for k in layers[0]}

    return {
        "tok_emb": jax.random.normal(k_tok, (input_dim, hidden_dim), jnp.float32) * 0.02,
        "pos_emb": jax.random.normal(k_pos, (max_length, hidden_dim), jnp.float32) * 0.02,
        "layers": packed,
    }


def encoder_forward(params, source_ids, source_mask, n_heads):
    """source_ids: [B, S] int32 tokens; source_mask: [B, 1, S] f32 (1 keep / 0 pad)."""
    B, S = source_ids.shape
    H = params["tok_emb"].shape[1]
    scale = jnp.sqrt(jnp.float32(H))
    positions = jnp.arange(S, dtype=jnp.int32)[None, :]
    # Embedding gathers are plain-JAX glue; the fused layer stack runs in one Pallas call.
    # TODO(synk): embedding gather could move in-kernel via scalar-prefetch if it ever matters.
    x = params["tok_emb"][source_ids] * scale + params["pos_emb"][positions]  # [B, S, H]
    x = x.astype(jnp.float32)
    mask_bias = (source_mask.astype(jnp.float32) - 1.0) * jnp.float32(1e10)   # 0 keep / -1e10 mask
    return encoder_layers_fused(x, mask_bias, params["layers"], n_heads)


if __name__ == "__main__":
    # Small, forward-consistent shapes.
    input_dim = 50      # vocab size
    hidden_dim = 32
    n_layers = 2
    n_heads = 4
    ff_dim = 64
    max_length = 100
    batch, seq = 2, 8

    key = jax.random.PRNGKey(0)
    k_param, k_tok = jax.random.split(key)

    params = init_params(k_param, input_dim, hidden_dim, n_layers, n_heads, ff_dim, max_length)

    source = jax.random.randint(k_tok, (batch, seq), 1, input_dim, dtype=jnp.int32)
    # Pad the last two tokens of the second sequence to exercise masking.
    source = source.at[1, -2:].set(0)
    source_mask = (source != 0).astype(jnp.float32)[:, None, :]   # [B, 1, S]

    out = encoder_forward(params, source, source_mask, n_heads)
    out = jax.block_until_ready(out)

    assert out.shape == (batch, seq, hidden_dim)
    assert bool(jnp.all(jnp.isfinite(out)))
    print("KERNEL_OK")
</pallas_src>

<mosaic_0001>
module attributes {stable_mosaic.version = 11 : i64} {
  func.func @fused_encoder_kernel(%arg0: i32, %arg1: i32, %arg2: memref<1x8x32xf32, #tpu.memory_space<vmem>>, %arg3: memref<1x1x8xf32, #tpu.memory_space<vmem>>, %arg4: memref<1x4x32x8xbf16, #tpu.memory_space<vmem>>, %arg5: memref<1x4x1x8xf32, #tpu.memory_space<vmem>>, %arg6: memref<1x4x32x8xbf16, #tpu.memory_space<vmem>>, %arg7: memref<1x4x1x8xf32, #tpu.memory_space<vmem>>, %arg8: memref<1x4x32x8xbf16, #tpu.memory_space<vmem>>, %arg9: memref<1x4x1x8xf32, #tpu.memory_space<vmem>>, %arg10: memref<1x4x8x32xbf16, #tpu.memory_space<vmem>>, %arg11: memref<1x1x32xf32, #tpu.memory_space<vmem>>, %arg12: memref<1x1x32xf32, #tpu.memory_space<vmem>>, %arg13: memref<1x1x32xf32, #tpu.memory_space<vmem>>, %arg14: memref<1x32x64xbf16, #tpu.memory_space<vmem>>, %arg15: memref<1x1x64xf32, #tpu.memory_space<vmem>>, %arg16: memref<1x64x32xbf16, #tpu.memory_space<vmem>>, %arg17: memref<1x1x32xf32, #tpu.memory_space<vmem>>, %arg18: memref<1x1x32xf32, #tpu.memory_space<vmem>>, %arg19: memref<1x1x32xf32, #tpu.memory_space<vmem>>, %arg20: memref<1x8x32xf32, #tpu.memory_space<vmem>>, %arg21: memref<8x32xf32, #tpu.memory_space<vmem>>) attributes {dimension_semantics = [#tpu.dimension_semantics<parallel>, #tpu.dimension_semantics<arbitrary>], iteration_bounds = array<i64: 2, 2>, scalar_prefetch = 0 : i64, scratch_operands = 1 : i64, tpu.core_type = #tpu.core_type<tc>, window_params = [{transform_indices = @transform_0, window_bounds = array<i64: 1, 8, 32>}, {transform_indices = @transform_1, window_bounds = array<i64: 1, 1, 8>}, {transform_indices = @transform_2, window_bounds = array<i64: 1, 4, 32, 8>}, {transform_indices = @transform_3, window_bounds = array<i64: 1, 4, 1, 8>}, {transform_indices = @transform_4, window_bounds = array<i64: 1, 4, 32, 8>}, {transform_indices = @transform_5, window_bounds = array<i64: 1, 4, 1, 8>}, {transform_indices = @transform_6, window_bounds = array<i64: 1, 4, 32, 8>}, {transform_indices = @transform_7, window_bounds = array<i64: 1, 4, 1, 8>}, {transform_indices = @transform_8, window_bounds = array<i64: 1, 4, 8, 32>}, {transform_indices = @transform_9, window_bounds = array<i64: 1, 1, 32>}, {transform_indices = @transform_10, window_bounds = array<i64: 1, 1, 32>}, {transform_indices = @transform_11, window_bounds = array<i64: 1, 1, 32>}, {transform_indices = @transform_12, window_bounds = array<i64: 1, 32, 64>}, {transform_indices = @transform_13, window_bounds = array<i64: 1, 1, 64>}, {transform_indices = @transform_14, window_bounds = array<i64: 1, 64, 32>}, {transform_indices = @transform_15, window_bounds = array<i64: 1, 1, 32>}, {transform_indices = @transform_16, window_bounds = array<i64: 1, 1, 32>}, {transform_indices = @transform_17, window_bounds = array<i64: 1, 1, 32>}, {transform_indices = @transform_18, window_bounds = array<i64: 1, 8, 32>}]} {
    %c0_i32 = arith.constant 0 : i32
    %0 = arith.cmpi eq, %arg1, %c0_i32 : i32
    %1 = arith.extui %0 : i1 to i32
    %c0_i32_0 = arith.constant 0 : i32
    %2 = arith.cmpi ne, %1, %c0_i32_0 : i32
    scf.if %2 {
      %c0_85 = arith.constant 0 : index
      %c0_86 = arith.constant 0 : index
      %c0_87 = arith.constant 0 : index
      %137 = vector.load %arg2[%c0_85, %c0_86, %c0_87] : memref<1x8x32xf32, #tpu.memory_space<vmem>>, vector<1x8x32xf32>
      %138 = vector.shape_cast %137 : vector<1x8x32xf32> to vector<8x32xf32>
      %c0_88 = arith.constant 0 : index
      %c0_89 = arith.constant 0 : index
      %139 = vector.load %arg21[%c0_88, %c0_89] : memref<8x32xf32, #tpu.memory_space<vmem>>, vector<8x32xf32>
      tpu.vector_store %arg21[%c0_88, %c0_89], %138 {strides = array<i32>} : memref<8x32xf32, #tpu.memory_space<vmem>>, vector<8x32xf32>,
    } else {
    }
    %c0 = arith.constant 0 : index
    %c0_1 = arith.constant 0 : index
    %3 = vector.load %arg21[%c0, %c0_1] : memref<8x32xf32, #tpu.memory_space<vmem>>, vector<8x32xf32>
    %4 = arith.truncf %3 : vector<8x32xf32> to vector<8x32xbf16>
    %5 = vector.shape_cast %4 : vector<8x32xbf16> to vector<1x8x32xbf16>
    %6 = vector.shape_cast %5 : vector<1x8x32xbf16> to vector<1x8x32xbf16>
    %7 = vector.broadcast %6 : vector<1x8x32xbf16> to vector<4x8x32xbf16>
    %c0_2 = arith.constant 0 : index
    %c0_3 = arith.constant 0 : index
    %c0_4 = arith.constant 0 : index
    %c0_5 = arith.constant 0 : index
    %8 = vector.load %arg4[%c0_2, %c0_3, %c0_4, %c0_5] : memref<1x4x32x8xbf16, #tpu.memory_space<vmem>>, vector<1x4x32x8xbf16>
    %9 = vector.shape_cast %8 : vector<1x4x32x8xbf16> to vector<4x32x8xbf16>
    "tpu.trace_start"() <{level = 10 : i32, message = "nsh,nhd->nsd"}> : () -> ()
    %cst = arith.constant dense<0.000000e+00> : vector<4x8x8xf32>
    %10 = tpu.matmul %7, %9, %cst {dimension_numbers = #tpu.dot_dimension_numbers<[2], [1], [1], [2], [0, 0, 0, 1, 1, 2], [0], [0]>} : vector<4x8x32xbf16>, vector<4x32x8xbf16>, vector<4x8x8xf32> -> vector<4x8x8xf32>
    "tpu.trace_stop"() : () -> ()
    %c0_6 = arith.constant 0 : index
    %c0_7 = arith.constant 0 : index
    %c0_8 = arith.constant 0 : index
    %c0_9 = arith.constant 0 : index
    %11 = vector.load %arg5[%c0_6, %c0_7, %c0_8, %c0_9] : memref<1x4x1x8xf32, #tpu.memory_space<vmem>>, vector<1x4x1x8xf32>
    %12 = vector.shape_cast %11 : vector<1x4x1x8xf32> to vector<4x1x8xf32>
    %13 = vector.broadcast %12 : vector<4x1x8xf32> to vector<4x8x8xf32>
    %14 = arith.addf %10, %13 : vector<4x8x8xf32>
    %c0_10 = arith.constant 0 : index
    %c0_11 = arith.constant 0 : index
    %c0_12 = arith.constant 0 : index
    %c0_13 = arith.constant 0 : index
    %15 = vector.load %arg6[%c0_10, %c0_11, %c0_12, %c0_13] : memref<1x4x32x8xbf16, #tpu.memory_space<vmem>>, vector<1x4x32x8xbf16>
    %16 = vector.shape_cast %15 : vector<1x4x32x8xbf16> to vector<4x32x8xbf16>
    "tpu.trace_start"() <{level = 10 : i32, message = "nsh,nhd->nsd"}> : () -> ()
    %cst_14 = arith.constant dense<0.000000e+00> : vector<4x8x8xf32>
    %17 = tpu.matmul %7, %16, %cst_14 {dimension_numbers = #tpu.dot_dimension_numbers<[2], [1], [1], [2], [0, 0, 0, 1, 1, 2], [0], [0]>} : vector<4x8x32xbf16>, vector<4x32x8xbf16>, vector<4x8x8xf32> -> vector<4x8x8xf32>
    "tpu.trace_stop"() : () -> ()
    %c0_15 = arith.constant 0 : index
    %c0_16 = arith.constant 0 : index
    %c0_17 = arith.constant 0 : index
    %c0_18 = arith.constant 0 : index
    %18 = vector.load %arg7[%c0_15, %c0_16, %c0_17, %c0_18] : memref<1x4x1x8xf32, #tpu.memory_space<vmem>>, vector<1x4x1x8xf32>
    %19 = vector.shape_cast %18 : vector<1x4x1x8xf32> to vector<4x1x8xf32>
    %20 = vector.broadcast %19 : vector<4x1x8xf32> to vector<4x8x8xf32>
    %21 = arith.addf %17, %20 : vector<4x8x8xf32>
    %c0_19 = arith.constant 0 : index
    %c0_20 = arith.constant 0 : index
    %c0_21 = arith.constant 0 : index
    %c0_22 = arith.constant 0 : index
    %22 = vector.load %arg8[%c0_19, %c0_20, %c0_21, %c0_22] : memref<1x4x32x8xbf16, #tpu.memory_space<vmem>>, vector<1x4x32x8xbf16>
    %23 = vector.shape_cast %22 : vector<1x4x32x8xbf16> to vector<4x32x8xbf16>
    "tpu.trace_start"() <{level = 10 : i32, message = "nsh,nhd->nsd"}> : () -> ()
    %cst_23 = arith.constant dense<0.000000e+00> : vector<4x8x8xf32>
    %24 = tpu.matmul %7, %23, %cst_23 {dimension_numbers = #tpu.dot_dimension_numbers<[2], [1], [1], [2], [0, 0, 0, 1, 1, 2], [0], [0]>} : vector<4x8x32xbf16>, vector<4x32x8xbf16>, vector<4x8x8xf32> -> vector<4x8x8xf32>
    "tpu.trace_stop"() : () -> ()
    %c0_24 = arith.constant 0 : index
    %c0_25 = arith.constant 0 : index
    %c0_26 = arith.constant 0 : index
    %c0_27 = arith.constant 0 : index
    %25 = vector.load %arg9[%c0_24, %c0_25, %c0_26, %c0_27] : memref<1x4x1x8xf32, #tpu.memory_space<vmem>>, vector<1x4x1x8xf32>
    %26 = vector.shape_cast %25 : vector<1x4x1x8xf32> to vector<4x1x8xf32>
    %27 = vector.broadcast %26 : vector<4x1x8xf32> to vector<4x8x8xf32>
    %28 = arith.addf %24, %27 : vector<4x8x8xf32>
    %29 = arith.truncf %14 : vector<4x8x8xf32> to vector<4x8x8xbf16>
    %30 = arith.truncf %21 : vector<4x8x8xf32> to vector<4x8x8xbf16>
    "tpu.trace_start"() <{level = 10 : i32, message = "nsd,ntd->nst"}> : () -> ()
    %cst_28 = arith.constant dense<0.000000e+00> : vector<4x8x8xf32>
    %31 = tpu.matmul %29, %30, %cst_28 {dimension_numbers = #tpu.dot_dimension_numbers<[2], [2], [1], [1], [0, 0, 0, 1, 1, 1], [0], [0]>} : vector<4x8x8xbf16>, vector<4x8x8xbf16>, vector<4x8x8xf32> -> vector<4x8x8xf32>
    "tpu.trace_stop"() : () -> ()
    %cst_29 = arith.constant 0.353553385 : f32
    %32 = vector.broadcast %cst_29 : f32 to vector<4x8x8xf32>
    %33 = arith.mulf %31, %32 : vector<4x8x8xf32>
    %c0_30 = arith.constant 0 : index
    %c0_31 = arith.constant 0 : index
    %c0_32 = arith.constant 0 : index
    %34 = vector.load %arg3[%c0_30, %c0_31, %c0_32] : memref<1x1x8xf32, #tpu.memory_space<vmem>>, vector<1x1x8xf32>
    %35 = vector.shape_cast %34 : vector<1x1x8xf32> to vector<1x8xf32>
    %36 = vector.shape_cast %35 : vector<1x8xf32> to vector<1x1x8xf32>
    %37 = vector.broadcast %36 : vector<1x1x8xf32> to vector<4x8x8xf32>
    %38 = arith.addf %33, %37 : vector<4x8x8xf32>
    %cst_33 = arith.constant dense<0xFF800000> : vector<4x8xf32>
    %39 = vector.multi_reduction <maximumf>, %38, %cst_33 [2] : vector<4x8x8xf32> to vector<4x8xf32>
    %40 = vector.shape_cast %39 : vector<4x8xf32> to vector<4x8x1xf32>
    %41 = vector.broadcast %40 : vector<4x8x1xf32> to vector<4x8x8xf32>
    %42 = arith.subf %38, %41 : vector<4x8x8xf32>
    %43 = math.exp %42 : vector<4x8x8xf32>
    %cst_34 = arith.constant dense<0.000000e+00> : vector<4x8xf32>
    %44 = vector.multi_reduction <add>, %43, %cst_34 [2] : vector<4x8x8xf32> to vector<4x8xf32>
    %45 = vector.shape_cast %44 : vector<4x8xf32> to vector<4x8x1xf32>
    %46 = tpu.reciprocal %45 {approx = true} : vector<4x8x1xf32> -> vector<4x8x1xf32>
    %47 = vector.broadcast %46 : vector<4x8x1xf32> to vector<4x8x8xf32>
    %48 = arith.mulf %43, %47 : vector<4x8x8xf32>
    %49 = arith.truncf %48 : vector<4x8x8xf32> to vector<4x8x8xbf16>
    %50 = arith.truncf %28 : vector<4x8x8xf32> to vector<4x8x8xbf16>
    "tpu.trace_start"() <{level = 10 : i32, message = "nst,ntd->nsd"}> : () -> ()
    %cst_35 = arith.constant dense<0.000000e+00> : vector<4x8x8xf32>
    %51 = tpu.matmul %49, %50, %cst_35 {dimension_numbers = #tpu.dot_dimension_numbers<[2], [1], [1], [2], [0, 0, 0, 1, 1, 2], [0], [0]>} : vector<4x8x8xbf16>, vector<4x8x8xbf16>, vector<4x8x8xf32> -> vector<4x8x8xf32>
    "tpu.trace_stop"() : () -> ()
    %52 = arith.truncf %51 : vector<4x8x8xf32> to vector<4x8x8xbf16>
    %c0_36 = arith.constant 0 : index
    %c0_37 = arith.constant 0 : index
    %c0_38 = arith.constant 0 : index
    %c0_39 = arith.constant 0 : index
    %53 = vector.load %arg10[%c0_36, %c0_37, %c0_38, %c0_39] : memref<1x4x8x32xbf16, #tpu.memory_space<vmem>>, vector<1x4x8x32xbf16>
    %54 = vector.shape_cast %53 : vector<1x4x8x32xbf16> to vector<4x8x32xbf16>
    "tpu.trace_start"() <{level = 10 : i32, message = "nsd,ndh->nsh"}> : () -> ()
    %cst_40 = arith.constant dense<0.000000e+00> : vector<4x8x32xf32>
    %55 = tpu.matmul %52, %54, %cst_40 {dimension_numbers = #tpu.dot_dimension_numbers<[2], [1], [1], [2], [0, 0, 0, 1, 1, 2], [0], [0]>} : vector<4x8x8xbf16>, vector<4x8x32xbf16>, vector<4x8x32xf32> -> vector<4x8x32xf32>
    "tpu.trace_stop"() : () -> ()
    %cst_41 = arith.constant dense<0.000000e+00> : vector<8x32xf32>
    %56 = vector.multi_reduction <add>, %55, %cst_41 [0] : vector<4x8x32xf32> to vector<8x32xf32>
    %c0_42 = arith.constant 0 : index
    %c0_43 = arith.constant 0 : index
    %c0_44 = arith.constant 0 : index
    %57 = vector.load %arg11[%c0_42, %c0_43, %c0_44] : memref<1x1x32xf32, #tpu.memory_space<vmem>>, vector<1x1x32xf32>
    %58 = vector.shape_cast %57 : vector<1x1x32xf32> to vector<1x32xf32>
    %59 = vector.broadcast %58 : vector<1x32xf32> to vector<8x32xf32>
    %60 = arith.addf %56, %59 : vector<8x32xf32>
    %61 = arith.addf %3, %60 : vector<8x32xf32>
    %cst_45 = arith.constant dense<0.000000e+00> : vector<8xf32>
    %62 = vector.multi_reduction <add>, %61, %cst_45 [1] : vector<8x32xf32> to vector<8xf32>
    %63 = vector.shape_cast %62 : vector<8xf32> to vector<8x1xf32>
    %cst_46 = arith.constant 3.200000e+01 : f32
    %64 = vector.broadcast %cst_46 : f32 to vector<8x1xf32>
    %65 = arith.divf %63, %64 : vector<8x1xf32>
    %66 = vector.broadcast %65 : vector<8x1xf32> to vector<8x32xf32>
    %67 = arith.subf %61, %66 : vector<8x32xf32>
    %68 = arith.mulf %67, %67 : vector<8x32xf32>
    %cst_47 = arith.constant dense<0.000000e+00> : vector<8xf32>
    %69 = vector.multi_reduction <add>, %68, %cst_47 [1] : vector<8x32xf32> to vector<8xf32>
    %70 = vector.shape_cast %69 : vector<8xf32> to vector<8x1xf32>
    %cst_48 = arith.constant 3.200000e+01 : f32
    %71 = vector.broadcast %cst_48 : f32 to vector<8x1xf32>
    %72 = arith.divf %70, %71 : vector<8x1xf32>
    %73 = vector.broadcast %65 : vector<8x1xf32> to vector<8x32xf32>
    %74 = arith.subf %61, %73 : vector<8x32xf32>
    %cst_49 = arith.constant 9.99999974E-6 : f32
    %75 = vector.broadcast %cst_49 : f32 to vector<8x1xf32>
    %76 = arith.addf %72, %75 : vector<8x1xf32>
    %77 = math.rsqrt %76 : vector<8x1xf32>
    %78 = vector.broadcast %77 : vector<8x1xf32> to vector<8x32xf32>
    %79 = arith.mulf %74, %78 : vector<8x32xf32>
    %c0_50 = arith.constant 0 : index
    %c0_51 = arith.constant 0 : index
    %c0_52 = arith.constant 0 : index
    %80 = vector.load %arg12[%c0_50, %c0_51, %c0_52] : memref<1x1x32xf32, #tpu.memory_space<vmem>>, vector<1x1x32xf32>
    %81 = vector.shape_cast %80 : vector<1x1x32xf32> to vector<1x32xf32>
    %82 = vector.broadcast %81 : vector<1x32xf32> to vector<8x32xf32>
    %83 = arith.mulf %79, %82 : vector<8x32xf32>
    %c0_53 = arith.constant 0 : index
    %c0_54 = arith.constant 0 : index
    %c0_55 = arith.constant 0 : index
    %84 = vector.load %arg13[%c0_53, %c0_54, %c0_55] : memref<1x1x32xf32, #tpu.memory_space<vmem>>, vector<1x1x32xf32>
    %85 = vector.shape_cast %84 : vector<1x1x32xf32> to vector<1x32xf32>
    %86 = vector.broadcast %85 : vector<1x32xf32> to vector<8x32xf32>
    %87 = arith.addf %83, %86 : vector<8x32xf32>
    %88 = arith.truncf %87 : vector<8x32xf32> to vector<8x32xbf16>
    %c0_56 = arith.constant 0 : index
    %c0_57 = arith.constant 0 : index
    %c0_58 = arith.constant 0 : index
    %89 = vector.load %arg14[%c0_56, %c0_57, %c0_58] : memref<1x32x64xbf16, #tpu.memory_space<vmem>>, vector<1x32x64xbf16>
    %90 = vector.shape_cast %89 : vector<1x32x64xbf16> to vector<32x64xbf16>
    %cst_59 = arith.constant dense<0.000000e+00> : vector<8x64xf32>
    %91 = tpu.matmul %88, %90, %cst_59 {dimension_numbers = #tpu.dot_dimension_numbers<[1], [0], [0], [1], [0, 0, 1, 1], [], []>} : vector<8x32xbf16>, vector<32x64xbf16>, vector<8x64xf32> -> vector<8x64xf32>
    %c0_60 = arith.constant 0 : index
    %c0_61 = arith.constant 0 : index
    %c0_62 = arith.constant 0 : index
    %92 = vector.load %arg15[%c0_60, %c0_61, %c0_62] : memref<1x1x64xf32, #tpu.memory_space<vmem>>, vector<1x1x64xf32>
    %93 = vector.shape_cast %92 : vector<1x1x64xf32> to vector<1x64xf32>
    %94 = vector.broadcast %93 : vector<1x64xf32> to vector<8x64xf32>
    %95 = arith.addf %91, %94 : vector<8x64xf32>
    %cst_63 = arith.constant 0.000000e+00 : f32
    %96 = vector.broadcast %cst_63 : f32 to vector<8x64xf32>
    %97 = arith.maximumf %95, %96 : vector<8x64xf32>
    %98 = arith.truncf %97 : vector<8x64xf32> to vector<8x64xbf16>
    %c0_64 = arith.constant 0 : index
    %c0_65 = arith.constant 0 : index
    %c0_66 = arith.constant 0 : index
    %99 = vector.load %arg16[%c0_64, %c0_65, %c0_66] : memref<1x64x32xbf16, #tpu.memory_space<vmem>>, vector<1x64x32xbf16>
    %100 = vector.shape_cast %99 : vector<1x64x32xbf16> to vector<64x32xbf16>
    %cst_67 = arith.constant dense<0.000000e+00> : vector<8x32xf32>
    %101 = tpu.matmul %98, %100, %cst_67 {dimension_numbers = #tpu.dot_dimension_numbers<[1], [0], [0], [1], [0, 0, 1, 1], [], []>} : vector<8x64xbf16>, vector<64x32xbf16>, vector<8x32xf32> -> vector<8x32xf32>
    %c0_68 = arith.constant 0 : index
    %c0_69 = arith.constant 0 : index
    %c0_70 = arith.constant 0 : index
    %102 = vector.load %arg17[%c0_68, %c0_69, %c0_70] : memref<1x1x32xf32, #tpu.memory_space<vmem>>, vector<1x1x32xf32>
    %103 = vector.shape_cast %102 : vector<1x1x32xf32> to vector<1x32xf32>
    %104 = vector.broadcast %103 : vector<1x32xf32> to vector<8x32xf32>
    %105 = arith.addf %101, %104 : vector<8x32xf32>
    %106 = arith.addf %87, %105 : vector<8x32xf32>
    %cst_71 = arith.constant dense<0.000000e+00> : vector<8xf32>
    %107 = vector.multi_reduction <add>, %106, %cst_71 [1] : vector<8x32xf32> to vector<8xf32>
    %108 = vector.shape_cast %107 : vector<8xf32> to vector<8x1xf32>
    %cst_72 = arith.constant 3.200000e+01 : f32
    %109 = vector.broadcast %cst_72 : f32 to vector<8x1xf32>
    %110 = arith.divf %108, %109 : vector<8x1xf32>
    %111 = vector.broadcast %110 : vector<8x1xf32> to vector<8x32xf32>
    %112 = arith.subf %106, %111 : vector<8x32xf32>
    %113 = arith.mulf %112, %112 : vector<8x32xf32>
    %cst_73 = arith.constant dense<0.000000e+00> : vector<8xf32>
    %114 = vector.multi_reduction <add>, %113, %cst_73 [1] : vector<8x32xf32> to vector<8xf32>
    %115 = vector.shape_cast %114 : vector<8xf32> to vector<8x1xf32>
    %cst_74 = arith.constant 3.200000e+01 : f32
    %116 = vector.broadcast %cst_74 : f32 to vector<8x1xf32>
    %117 = arith.divf %115, %116 : vector<8x1xf32>
    %118 = vector.broadcast %110 : vector<8x1xf32> to vector<8x32xf32>
    %119 = arith.subf %106, %118 : vector<8x32xf32>
    %cst_75 = arith.constant 9.99999974E-6 : f32
    %120 = vector.broadcast %cst_75 : f32 to vector<8x1xf32>
    %121 = arith.addf %117, %120 : vector<8x1xf32>
    %122 = math.rsqrt %121 : vector<8x1xf32>
    %123 = vector.broadcast %122 : vector<8x1xf32> to vector<8x32xf32>
    %124 = arith.mulf %119, %123 : vector<8x32xf32>
    %c0_76 = arith.constant 0 : index
    %c0_77 = arith.constant 0 : index
    %c0_78 = arith.constant 0 : index
    %125 = vector.load %arg18[%c0_76, %c0_77, %c0_78] : memref<1x1x32xf32, #tpu.memory_space<vmem>>, vector<1x1x32xf32>
    %126 = vector.shape_cast %125 : vector<1x1x32xf32> to vector<1x32xf32>
    %127 = vector.broadcast %126 : vector<1x32xf32> to vector<8x32xf32>
    %128 = arith.mulf %124, %127 : vector<8x32xf32>
    %c0_79 = arith.constant 0 : index
    %c0_80 = arith.constant 0 : index
    %c0_81 = arith.constant 0 : index
    %129 = vector.load %arg19[%c0_79, %c0_80, %c0_81] : memref<1x1x32xf32, #tpu.memory_space<vmem>>, vector<1x1x32xf32>
    %130 = vector.shape_cast %129 : vector<1x1x32xf32> to vector<1x32xf32>
    %131 = vector.broadcast %130 : vector<1x32xf32> to vector<8x32xf32>
    %132 = arith.addf %128, %131 : vector<8x32xf32>
    %c0_82 = arith.constant 0 : index
    %c0_83 = arith.constant 0 : index
    %133 = vector.load %arg21[%c0_82, %c0_83] : memref<8x32xf32, #tpu.memory_space<vmem>>, vector<8x32xf32>
    tpu.vector_store %arg21[%c0_82, %c0_83], %132 {strides = array<i32>} : memref<8x32xf32, #tpu.memory_space<vmem>>, vector<8x32xf32>,
    %c1_i32 = arith.constant 1 : i32
    %134 = arith.cmpi eq, %arg1, %c1_i32 : i32
    %135 = arith.extui %134 : i1 to i32
    %c0_i32_84 = arith.constant 0 : i32
    %136 = arith.cmpi ne, %135, %c0_i32_84 : i32
    scf.if %136 {
      %c0_85 = arith.constant 0 : index
      %c0_86 = arith.constant 0 : index
      %c0_87 = arith.constant 0 : index
      %137 = vector.load %arg20[%c0_85, %c0_86, %c0_87] : memref<1x8x32xf32, #tpu.memory_space<vmem>>, vector<1x8x32xf32>
      %138 = vector.shape_cast %137 : vector<1x8x32xf32> to vector<8x32xf32>
      %139 = vector.shape_cast %132 : vector<8x32xf32> to vector<1x8x32xf32>
      tpu.vector_store %arg20[%c0_85, %c0_86, %c0_87], %139 {strides = array<i32>} : memref<1x8x32xf32, #tpu.memory_space<vmem>>, vector<1x8x32xf32>,
    } else {
    }
    return
  }
  func.func @transform_0(%arg0: i32, %arg1: i32) -> (i32, i32, i32) {
    %c0_i32 = arith.constant 0 : i32
    %c0_i32_0 = arith.constant 0 : i32
    %c0_i32_1 = arith.constant 0 : i32
    return %arg0, %c0_i32, %c0_i32_0 : i32, i32, i32
  }
  func.func @transform_1(%arg0: i32, %arg1: i32) -> (i32, i32, i32) {
    %c0_i32 = arith.constant 0 : i32
    %c0_i32_0 = arith.constant 0 : i32
    %c0_i32_1 = arith.constant 0 : i32
    return %arg0, %c0_i32, %c0_i32_0 : i32, i32, i32
  }
  func.func @transform_2(%arg0: i32, %arg1: i32) -> (i32, i32, i32, i32) {
    %c0_i32 = arith.constant 0 : i32
    %c0_i32_0 = arith.constant 0 : i32
    %c0_i32_1 = arith.constant 0 : i32
    %c0_i32_2 = arith.constant 0 : i32
    return %arg1, %c0_i32, %c0_i32_0, %c0_i32_1 : i32, i32, i32, i32
  }
  func.func @transform_3(%arg0: i32, %arg1: i32) -> (i32, i32, i32, i32) {
    %c0_i32 = arith.constant 0 : i32
    %c0_i32_0 = arith.constant 0 : i32
    %c0_i32_1 = arith.constant 0 : i32
    %c0_i32_2 = arith.constant 0 : i32
    return %arg1, %c0_i32, %c0_i32_0, %c0_i32_1 : i32, i32, i32, i32
  }
  func.func @transform_4(%arg0: i32, %arg1: i32) -> (i32, i32, i32, i32) {
    %c0_i32 = arith.constant 0 : i32
    %c0_i32_0 = arith.constant 0 : i32
    %c0_i32_1 = arith.constant 0 : i32
    %c0_i32_2 = arith.constant 0 : i32
    return %arg1, %c0_i32, %c0_i32_0, %c0_i32_1 : i32, i32, i32, i32
  }
  func.func @transform_5(%arg0: i32, %arg1: i32) -> (i32, i32, i32, i32) {
    %c0_i32 = arith.constant 0 : i32
    %c0_i32_0 = arith.constant 0 : i32
    %c0_i32_1 = arith.constant 0 : i32
    %c0_i32_2 = arith.constant 0 : i32
    return %arg1, %c0_i32, %c0_i32_0, %c0_i32_1 : i32, i32, i32, i32
  }
  func.func @transform_6(%arg0: i32, %arg1: i32) -> (i32, i32, i32, i32) {
    %c0_i32 = arith.constant 0 : i32
    %c0_i32_0 = arith.constant 0 : i32
    %c0_i32_1 = arith.constant 0 : i32
    %c0_i32_2 = arith.constant 0 : i32
    return %arg1, %c0_i32, %c0_i32_0, %c0_i32_1 : i32, i32, i32, i32
  }
  func.func @transform_7(%arg0: i32, %arg1: i32) -> (i32, i32, i32, i32) {
    %c0_i32 = arith.constant 0 : i32
    %c0_i32_0 = arith.constant 0 : i32
    %c0_i32_1 = arith.constant 0 : i32
    %c0_i32_2 = arith.constant 0 : i32
    return %arg1, %c0_i32, %c0_i32_0, %c0_i32_1 : i32, i32, i32, i32
  }
  func.func @transform_8(%arg0: i32, %arg1: i32) -> (i32, i32, i32, i32) {
    %c0_i32 = arith.constant 0 : i32
    %c0_i32_0 = arith.constant 0 : i32
    %c0_i32_1 = arith.constant 0 : i32
    %c0_i32_2 = arith.constant 0 : i32
    return %arg1, %c0_i32, %c0_i32_0, %c0_i32_1 : i32, i32, i32, i32
  }
  func.func @transform_9(%arg0: i32, %arg1: i32) -> (i32, i32, i32) {
    %c0_i32 = arith.constant 0 : i32
    %c0_i32_0 = arith.constant 0 : i32
    %c0_i32_1 = arith.constant 0 : i32
    return %arg1, %c0_i32, %c0_i32_0 : i32, i32, i32
  }
  func.func @transform_10(%arg0: i32, %arg1: i32) -> (i32, i32, i32) {
    %c0_i32 = arith.constant 0 : i32
    %c0_i32_0 = arith.constant 0 : i32
    %c0_i32_1 = arith.constant 0 : i32
    return %arg1, %c0_i32, %c0_i32_0 : i32, i32, i32
  }
  func.func @transform_11(%arg0: i32, %arg1: i32) -> (i32, i32, i32) {
    %c0_i32 = arith.constant 0 : i32
    %c0_i32_0 = arith.constant 0 : i32
    %c0_i32_1 = arith.constant 0 : i32
    return %arg1, %c0_i32, %c0_i32_0 : i32, i32, i32
  }
  func.func @transform_12(%arg0: i32, %arg1: i32) -> (i32, i32, i32) {
    %c0_i32 = arith.constant 0 : i32
    %c0_i32_0 = arith.constant 0 : i32
    %c0_i32_1 = arith.constant 0 : i32
    return %arg1, %c0_i32, %c0_i32_0 : i32, i32, i32
  }
  func.func @transform_13(%arg0: i32, %arg1: i32) -> (i32, i32, i32) {
    %c0_i32 = arith.constant 0 : i32
    %c0_i32_0 = arith.constant 0 : i32
    %c0_i32_1 = arith.constant 0 : i32
    return %arg1, %c0_i32, %c0_i32_0 : i32, i32, i32
  }
  func.func @transform_14(%arg0: i32, %arg1: i32) -> (i32, i32, i32) {
    %c0_i32 = arith.constant 0 : i32
    %c0_i32_0 = arith.constant 0 : i32
    %c0_i32_1 = arith.constant 0 : i32
    return %arg1, %c0_i32, %c0_i32_0 : i32, i32, i32
  }
  func.func @transform_15(%arg0: i32, %arg1: i32) -> (i32, i32, i32) {
    %c0_i32 = arith.constant 0 : i32
    %c0_i32_0 = arith.constant 0 : i32
    %c0_i32_1 = arith.constant 0 : i32
    return %arg1, %c0_i32, %c0_i32_0 : i32, i32, i32
  }
  func.func @transform_16(%arg0: i32, %arg1: i32) -> (i32, i32, i32) {
    %c0_i32 = arith.constant 0 : i32
    %c0_i32_0 = arith.constant 0 : i32
    %c0_i32_1 = arith.constant 0 : i32
    return %arg1, %c0_i32, %c0_i32_0 : i32, i32, i32
  }
  func.func @transform_17(%arg0: i32, %arg1: i32) -> (i32, i32, i32) {
    %c0_i32 = arith.constant 0 : i32
    %c0_i32_0 = arith.constant 0 : i32
    %c0_i32_1 = arith.constant 0 : i32
    return %arg1, %c0_i32, %c0_i32_0 : i32, i32, i32
  }
  func.func @transform_18(%arg0: i32, %arg1: i32) -> (i32, i32, i32) {
    %c0_i32 = arith.constant 0 : i32
    %c0_i32_0 = arith.constant 0 : i32
    %c0_i32_1 = arith.constant 0 : i32
    return %arg0, %c0_i32, %c0_i32_0 : i32, i32, i32
  }
}

</mosaic_0001>

<bundles_post_ra>
// kernel: tpu_custom_call.1
= control target key start
LH: loop header
LB: loop body
LE: loop exit
PB: predicated region body
PF: predicated region fallthrough
CT: control target
= control target key end

     0   :  { %s3941_s0 = inlined_call_operand.vmem [shape: f32[2,8,32], index: 0, kind: input, shape index: {}]   ;;  %s3942_s1 = inlined_call_operand.vmem [shape: f32[2,1,8], index: 1, kind: input, shape index: {}]   ;;  %s3943_s2 = inlined_call_operand.vmem [shape: bf16[2,4,32,8], index: 2, kind: input, shape index: {}]   ;;  %s3944_s3 = inlined_call_operand.vmem [shape: f32[2,4,1,8], index: 3, kind: input, shape index: {}]   ;;  %s3945_s4 = inlined_call_operand.vmem [shape: bf16[2,4,32,8], index: 4, kind: input, shape index: {}]   ;;  %s3946_s5 = inlined_call_operand.vmem [shape: f32[2,4,1,8], index: 5, kind: input, shape index: {}]   ;;  %s3947_s6 = inlined_call_operand.vmem [shape: bf16[2,4,32,8], index: 6, kind: input, shape index: {}]   ;;  %s3948_s7 = inlined_call_operand.vmem [shape: f32[2,4,1,8], index: 7, kind: input, shape index: {}]   ;;  %s3949_s8 = inlined_call_operand.vmem [shape: bf16[2,4,8,32], index: 8, kind: input, shape index: {}]   ;;  %s3950_s9 = inlined_call_operand.vmem [shape: f32[2,1,32], index: 9, kind: input, shape index: {}]   ;;  %s3951_s10 = inlined_call_operand.vmem [shape: f32[2,1,32], index: 10, kind: input, shape index: {}]   ;;  %s3952_s11 = inlined_call_operand.vmem [shape: f32[2,1,32], index: 11, kind: input, shape index: {}]   ;;  %s3953_s12 = inlined_call_operand.vmem [shape: bf16[2,32,64], index: 12, kind: input, shape index: {}]   ;;  %s3954_s13 = inlined_call_operand.vmem [shape: f32[2,1,64], index: 13, kind: input, shape index: {}]   ;;  %s3955_s14 = inlined_call_operand.vmem [shape: bf16[2,64,32], index: 14, kind: input, shape index: {}]   ;;  %s3956_s15 = inlined_call_operand.vmem [shape: f32[2,1,32], index: 15, kind: input, shape index: {}]   ;;  %s3957_s16 = inlined_call_operand.vmem [shape: f32[2,1,32], index: 16, kind: input, shape index: {}]   ;;  %s3958_s17 = inlined_call_operand.vmem [shape: f32[2,1,32], index: 17, kind: input, shape index: {}]   ;;  %s3959_s18 = inlined_call_operand.hbm [shape: f32[2,8,32], index: 18, kind: output, shape index: {}]  }
   0x1   :  { %3977 = sst [smem:[#allocation21_spill]] %s3941_s0 }
   0x2   :  { %3978 = sst [smem:[#allocation22_spill]] %s3942_s1 }
   0x3   :  { %3979 = sst [smem:[#allocation23_spill]] %s3943_s2 }
   0x4   :  { %3980 = sst [smem:[#allocation24_spill]] %s3944_s3 }
   0x5   :  { %3981 = sst [smem:[#allocation25_spill]] %s3945_s4 }
   0x6   :  { %3982 = sst [smem:[#allocation26_spill]] %s3946_s5 }
   0x7   :  { %3983 = sst [smem:[#allocation27_spill]] %s3947_s6 }
   0x8   :  { %3984 = sst [smem:[#allocation28_spill]] %s3948_s7 }
   0x9   :  { %3985 = sst [smem:[#allocation29_spill]] %s3949_s8 }
   0xa   :  { %3986 = sst [smem:[#allocation30_spill]] %s3950_s9 }
   0xb   :  { %3987 = sst [smem:[#allocation31_spill]] %s3951_s10 }
   0xc   :  { %3988 = sst [smem:[#allocation32_spill]] %s3952_s11 }
   0xd   :  { %3989 = sst [smem:[#allocation33_spill]] %s3953_s12 }
   0xe   :  { %3990 = sst [smem:[#allocation34_spill]] %s3955_s14 }
   0xf   :  { %3991 = sst [smem:[#allocation35_spill]] %s3956_s15 }
  0x10   :  { %3992 = sst [smem:[#allocation36_spill]] %s3957_s16 }
  0x11   :  { %3993 = sst [smem:[#allocation37_spill]] %s3958_s17 }
  0x12   :  { %3994 = sst [smem:[#allocation38_spill]] %s3959_s18 }
  0x13   :  { %23 = vsyncpa [#allocation4], 0 }
  0x14   :  { %25 = vsyncpa [#allocation4 + $0x1], 0  ;;  %s3454_s27 = smov 0   ;;  %s3456_s28 = smov 0  }
  0x15   :  { %s3458_s29 = smov 0   ;;  %s3460_s30 = smov 0  }
  0x16   :  { %s3462_s0 = smov 0   ;;  %s3464_s19 = smov 0  }
  0x17   :  { %s3466_s1 = smov 0   ;;  %s3468_s20 = smov 0  }
  0x18 LB: > { %3995 = sst [smem:[#allocation6_spill]] %s3326_s27  ;;  %s2771_s21 = sadd.s32 4294967295, %s3354_s20   ;;  %s3354_s20 = sphi %s3468_s20, %s31_s20   ;;  %s3350_s1 = sphi %s3466_s1, %s4058_s1   ;;  %s3346_s19 = sphi %s3464_s19, %s4057_s19   ;;  %s3342_s0 = sphi %s3462_s0, %s4056_s0   ;;  %s3338_s30 = sphi %s3460_s30, %s4055_s30   ;;  %s3334_s29 = sphi %s3458_s29, %s4054_s29   ;;  %s3330_s28 = sphi %s3456_s28, %s4053_s28   ;;  %s3326_s27 = sphi %s3454_s27, %s4052_s27  }
  0x19   : > { %3996 = sst [smem:[#allocation7_spill]] %s3330_s28  ;;  %s2772_s22 = sadd.s32 4294967294, %s3354_s20  }
  0x1a   : > { %3997 = sst [smem:[#allocation8_spill]] %s3334_s29  ;;  %s40_s2 = sadd.s32 1, %s3346_s19 }
  0x1b   : > { %3998 = sst [smem:[#allocation9_spill]] %s3338_s30  ;;  %p41_p0 = scmp.ge.s32.totalorder %s40_s2, 2 }
  0x1c   : > { %3999 = sst [smem:[#allocation10_spill]] %s3342_s0  ;;  %s43_s23 = sadd.s32 1, %s3350_s1 }
  0x1d   : > { %4000 = sst [smem:[#allocation11_spill]] %s3346_s19  ;;  %p528_p1 = scmp.ne.s32.totalorder %s3334_s29, %s3330_s28 }
  0x1e   : > { %4001 = sst [smem:[#allocation12_spill]] %s3350_s1  ;;  %p529_p2 = scmp.eq.s32.totalorder %s2771_s21, 3 }
  0x1f   : > { %4002 = sst [smem:[#allocation13_spill]] %s3354_s20  ;;  %s4060_s2 = smov (%p41_p0, %s40_s2), 0 }
  0x20   : > { %4003 = sst [smem:[#allocation14_spill]] %s4060_s2  ;;  %s4062_s23 = smov (!%p41_p0, %s43_s23), %s3350_s1 }
  0x21   : > { %p3503_p3 = por %p529_p2, %p528_p1  ;;  %p534_p4 = scmp.ne.s32.totalorder %s3330_s28, %s3326_s27 }
  0x22   : > { %p45_p5 = scmp.ge.s32.totalorder %s4062_s23, 2  ;;  %p535_p6 = scmp.eq.s32.totalorder %s2772_s22, 3 }
  0x23   : > { %s4004_s24 = scalar_select %p3503_p3, 1, 0 }
  0x24   : > { %p2775_p7 = scmp.ge.s32.totalorder %s3354_s20, 1  ;;  %p677_p8 = scmp.lt.s32.totalorder %s3354_s20, 5 }
  0x25   : > { %4005 = sst [smem:[#allocation15_spill]] %s4004_s24  ;;  %s4064_s23 = smov (%p45_p5, %s4062_s23), 0 }
  0x26   : > { %4006 = sst [smem:[#allocation16_spill]] %s4064_s23  ;;  %p3513_p9 = por %p535_p6, %p534_p4 }
  0x27   : > { %p678_p10 = pnand %p2775_p7, %p677_p8  ;;  %s515_s26 = ssub.s32 %s3350_s1, %s4064_s23 }
  0x28   : > { %s4007_s25 = scalar_select %p3513_p9, 1, 0 }
  0x29   : > { %s518_s21 = sadd.s32 1, %s3334_s29  ;;  %p516_p11 = scmp.eq.s32.totalorder %s515_s26, 0 }
  0x2a   : > { %4008 = sst [smem:[#allocation17_spill]] %s4007_s25  ;;  %681 = sbr.rel (%p678_p10) target bundleno = 2392 (0x958), region = 92 }
  0x2b   : > { %s3521_s2 = scalar_select %p516_p11, %s3334_s29, %s518_s21  }
  0x2d   : > { %4009 = sst [smem:[#allocation18_spill]] %s3521_s2 }
  0x31   : > { %s3965_s22 = sand.u32 1, %s3330_s28   ;;  %p796_p12 = scmp.lt.s32.totalorder %s3342_s0, 1 }
  0x32   : > { %s3527_s19 = sshll.u32 %s3965_s22, 3  ;;  %p803_p13 = scmp.lt.s32.totalorder %s3338_s30, 1 }
  0x33   : > { %s3531_s25 = scalar_select %p796_p12, %s3342_s0, 1 }
  0x34   : > { %s3534_s26 = scalar_select %p803_p13, %s3338_s30, 1 }
  0x35   : > { %4010 = sst [smem:[#allocation19_spill]] %s3531_s25  ;;  %s2777_s21 = sshll.u32 %s3531_s25, 3 }
  0x36   : > { %s4012_s20 = sld [smem:[#allocation21_spill]]  ;;  %s2875_s24 = sshll.u32 %s3534_s26, 6 }
  0x37   : > { %s4013_s30 = sld [smem:[#allocation23_spill]]  ;;  %s2780_s16 = sshll.u32 %s3534_s26, 2 }
  0x38   : > { %s4014_s3 = sld [smem:[#allocation24_spill]]  ;;  %s4016_s4 = sld [smem:[#allocation25_spill]] }
  0x39   : > { %s4017_s5 = sld [smem:[#allocation26_spill]]  ;;  %s4018_s6 = sld [smem:[#allocation27_spill]] }
  0x3a   : > { %s4019_s7 = sld [smem:[#allocation28_spill]]  ;;  %s2878_s2 = sshll.u32 %s3534_s26, 4 }
  0x3b   : > { %s4020_s8 = sld [smem:[#allocation29_spill]]  ;;  %s4024_s12 = sld [smem:[#allocation33_spill]] }
  0x3c   : > { %s799_s18 = scalar_lea.vmem %s4012_s20, %s2777_s21  ;;  %s4027_s14 = sld [smem:[#allocation36_spill]] }
  0x3d   : > { %s3548_s17 = scalar_lea.vmem %s4013_s30, %s2875_s24  ;;  %s4029_s23 = sld [smem:[#allocation9_spill]] }
  0x3e   : > { %s3554_s1 = scalar_lea.vmem %s4014_s3, %s2780_s16  ;;  %s3559_s27 = scalar_lea.vmem %s4016_s4, %s2875_s24 }
  0x3f   : > { %4015 = sst [smem:[#allocation20_spill]] %s3554_s1  ;;  %s3564_s28 = scalar_lea.vmem %s4017_s5, %s2780_s16 }
  0x40   : > { %s3569_s21 = scalar_lea.vmem %s4018_s6, %s2875_s24  ;;  %s3574_s29 = scalar_lea.vmem %s4019_s7, %s2780_s16 }
  0x41   : > { %s3580_s4 = scalar_lea.vmem %s4020_s8, %s2878_s2  ;;  %s3597_s6 = scalar_lea.vmem %s4024_s12, %s2878_s2 }
  0x42   : > { %s851_s7 = scalar_lea.vmem %s3954_s13, %s3534_s26  ;;  %s2880_s8 = sshll.u32 %s3534_s26, 5 }
  0x43   : > { %s4025_s5 = sld [smem:[#allocation35_spill]]  ;;  %s4026_s24 = sld [smem:[#allocation34_spill]] }
  0x44   : > { %s862_s16 = scalar_lea.vmem %s4027_s14, %s3534_s26  ;;  %s4028_s12 = sld [smem:[#allocation37_spill]] }
  0x45   : > { %s795_s3 = scalar_lea.vmem [#allocation3], %s3527_s19  ;;  %p2793_p0 = scmp.ne.s32.totalorder %s4029_s23, 0 }
  0x46   : > { %v871_v0 = vld [vmem:[%s799_s18] sm:$0xff] (!%p2793_p0)  ;;  %vm872_vm0 = vcmask (!%p2793_p0), 261120  }
  0x47   : > { %870 = sbr.rel (%p2793_p0) target bundleno = 78 (0x4e), region = 96  ;;  %873 = vst.msk [vmem:[#allocation2] sm:$0xff] (!%p2793_p0), %vm872_vm0, %v871_v0 }
  0x49   : > { %s859_s9 = scalar_lea.vmem %s4025_s5, %s3534_s26  ;;  %s3611_s10 = scalar_lea.vmem %s4026_s24, %s2880_s8 }
  0x4a   : > { %s865_s11 = scalar_lea.vmem %s4028_s12, %s3534_s26 }
  0x4e PF: > { %v3210_v1 = vld [vmem:[%s3548_s17] sm:$0xff]   ;;  %v3356_v2 = vmov 0.0   ;;  %v3211_v3 = vld [vmem:[%s3548_s17 + $0x10] sm:$0xff]   ;;  %v3212_v4 = vld [vmem:[%s3548_s17 + $0x8] sm:$0xff]   ;;  %vm3357_vm1 = vmmov 0   ;;  %vm932_vm2 = vcmask 261120  }
  0x4f   : > { %2949 = vmatprep.subr.bf16.mxu0 %v3356_v2  ;;  %2957 = vmatprep.subr.bf16.mxu1 %v3356_v2  ;;  %v3213_v5 = vld [vmem:[%s3548_s17 + $0x18] sm:$0xff]   ;;  %v3635_v6 = vld [vmem:[#allocation2] sm:$0xff]  ;;  %v3215_v9 = vld [vmem:[%s3548_s17 + $0x30] sm:$0xff]   ;;  %s4030_s5 = sld [smem:[#allocation20_spill]]  ;;  %vm1644_vm3 = vcmask 64512   ;;  %vm1899_vm4 = vcmask 1043456  }
  0x50   : > { %2950 = vmatpush3.bf16.msra.mxu0 %v3210_v1  ;;  %2953 = vmatprep.mubr.msk.bf16.mxu0 %vm3357_vm1, %v3356_v2  ;;  %v3639_v7 = vpack.c.bf16 %v3635_v6, %v3635_v6  ;;  %v3214_v8 = vld [vmem:[%s3548_s17 + $0x20] sm:$0xff]   ;;  %v3216_v10 = vld [vmem:[%s3548_s17 + $0x28] sm:$0xff]   ;;  %v3217_v11 = vld [vmem:[%s3548_s17 + $0x38] sm:$0xff]   ;;  %s4031_s8 = sld [smem:[#allocation19_spill]]  ;;  %s4032_s18 = sld [smem:[#allocation22_spill]]  ;;  %vm2427_vm5 = vcmask 523264  }
  0x51   : > { %2958 = vmatpush3.bf16.msra.mxu1 %v3211_v3  ;;  %2951 = vmatprep.subr.bf16.mxu0 %v3356_v2  ;;  %v3218_v12 = vld [vmem:[%s3559_s27] sm:$0xff]   ;;  %v3219_v13 = vld [vmem:[%s3559_s27 + $0x10] sm:$0xff]   ;;  %v3220_v14 = vld [vmem:[%s3559_s27 + $0x8] sm:$0xff]   ;;  %s4036_s14 = sld [smem:[#allocation31_spill]]  ;;  %s4038_s1 = sld [smem:[#allocation32_spill]] }
  0x52   : > { %2959 = vmatprep.subr.bf16.mxu1 %v3356_v2  ;;  %2961 = vmatprep.mubr.msk.bf16.mxu1 %vm3357_vm1, %v3356_v2  ;;  %v3221_v15 = vld [vmem:[%s3559_s27 + $0x18] sm:$0xff]   ;;  %v3222_v16 = vld [vmem:[%s3559_s27 + $0x20] sm:$0xff]   ;;  %v3223_v17 = vld [vmem:[%s3559_s27 + $0x30] sm:$0xff]  }
  0x53   : > { %v3224_v18 = vld [vmem:[%s3559_s27 + $0x28] sm:$0xff]   ;;  %v3225_v19 = vld [vmem:[%s3559_s27 + $0x38] sm:$0xff]   ;;  %v3226_v20 = vld [vmem:[%s3569_s21] sm:$0xff]  }
  0x54   : > { %2952 = vmatpush3.bf16.msra.mxu0 %v3212_v4  ;;  %v3227_v21 = vld [vmem:[%s3569_s21 + $0x10] sm:$0xff]   ;;  %v3228_v22 = vld [vmem:[%s3569_s21 + $0x8] sm:$0xff]   ;;  %v3229_v23 = vld [vmem:[%s3569_s21 + $0x18] sm:$0xff]  }
  0x55   : > { %2960 = vmatpush3.bf16.msra.mxu1 %v3213_v5  ;;  %2965 = vmatprep.subr.bf16.mxu0 %v3356_v2  ;;  %v3230_v24 = vld [vmem:[%s3569_s21 + $0x20] sm:$0xff]   ;;  %v3231_v25 = vld [vmem:[%s3569_s21 + $0x30] sm:$0xff]   ;;  %v3232_v26 = vld [vmem:[%s3569_s21 + $0x28] sm:$0xff]  }
  0x56   : > { %2973 = vmatprep.subr.bf16.mxu1 %v3356_v2  ;;  %v3233_v27 = vld [vmem:[%s3569_s21 + $0x38] sm:$0xff]   ;;  %v2810_v44 = vld [vmem:[%s3564_s28] ss:$0 sm:$0xff]  ;;  %v2811_v45 = vld [vmem:[%s3564_s28 + $0x1] ss:$0 sm:$0xff]  ;;  %s4033_s27 = scalar_lea.vmem %s4032_s18, %s4031_s8  ;;  %s4043_s18 = sld [smem:[#allocation9_spill]] }
  0x57   : > { %2954 = vmatmul.mubr.msk.bf16.vlgmr.msra.gmra.mrb[0].mxu0 %vm932_vm2, %v3639_v7  ;;  %v2794_v56 = vld [vmem:[%s4030_s5] ss:$0 sm:$0xff]  ;;  %v2795_v59 = vld [vmem:[%s4030_s5 + $0x1] ss:$0 sm:$0xff]  ;;  %v2812_v62 = vld [vmem:[%s3564_s28 + $0x2] ss:$0 sm:$0xff]  ;;  %s4037_s20 = scalar_lea.vmem %s4036_s14, %s3534_s26  ;;  %s4039_s30 = scalar_lea.vmem %s4038_s1, %s3534_s26 }
  0x58   : > { %2962 = vmatmul.mubr.msk.bf16.vlgmr.msra.gmra.mrb[0].mxu1 %vm932_vm2, %v3639_v7  ;;  %2966 = vmatpush3.bf16.msra.mxu0 %v3214_v8  ;;  %v2813_v0 = vld [vmem:[%s3564_s28 + $0x3] ss:$0 sm:$0xff]  ;;  %s4034_s28 = sld [smem:[#allocation30_spill]] }
  0x59   : > { %2974 = vmatpush3.bf16.msra.mxu1 %v3215_v9  ;;  %2967 = vmatprep.subr.bf16.mxu0 %v3356_v2 }
  0x5a   : > { %2975 = vmatprep.subr.bf16.mxu1 %v3356_v2  ;;  %2969 = vmatprep.mubr.msk.bf16.mxu0 %vm3357_vm1, %v3356_v2 }
  0x5b   : > { %2977 = vmatprep.mubr.msk.bf16.mxu1 %vm3357_vm1, %v3356_v2 }
  0x5c   : > { %2968 = vmatpush3.bf16.msra.mxu0 %v3216_v10  ;;  %p2870_p1 = scmp.ne.s32.totalorder %s4043_s18, 1 }
  0x5d   : > { %2976 = vmatpush3.bf16.msra.mxu1 %v3217_v11  ;;  %2981 = vmatprep.subr.bf16.mxu0 %v3356_v2 }
  0x5e   : > { %2989 = vmatprep.subr.bf16.mxu1 %v3356_v2  ;;  %s4035_s21 = scalar_lea.vmem %s4034_s28, %s3534_s26 }
  0x5f   : > { %2970 = vmatmul.mubr.msk.bf16.vlgmr.msra.gmra.mrb[4].mxu0 %vm932_vm2, %v3639_v7 }
  0x60   : > { %2978 = vmatmul.mubr.msk.bf16.vlgmr.msra.gmra.mrb[4].mxu1 %vm932_vm2, %v3639_v7  ;;  %2982 = vmatpush3.bf16.msra.mxu0 %v3218_v12 }
  0x61   : > { %2990 = vmatpush3.bf16.msra.mxu1 %v3219_v13  ;;  %2983 = vmatprep.subr.bf16.mxu0 %v3356_v2 }
  0x62   : > { %2991 = vmatprep.subr.bf16.mxu1 %v3356_v2  ;;  %2985 = vmatprep.mubr.msk.bf16.mxu0 %vm3357_vm1, %v3356_v2 }
  0x63   : > { %2993 = vmatprep.mubr.msk.bf16.mxu1 %vm3357_vm1, %v3356_v2 }
  0x64   : > { %2984 = vmatpush3.bf16.msra.mxu0 %v3220_v14 }
  0x65   : > { %2992 = vmatpush3.bf16.msra.mxu1 %v3221_v15  ;;  %2997 = vmatprep.subr.bf16.mxu0 %v3356_v2 }
  0x66   : > { %3005 = vmatprep.subr.bf16.mxu1 %v3356_v2 }
  0x67   : > { %2986 = vmatmul.mubr.msk.bf16.vlgmr.msra.gmra.mrb[8].mxu0 %vm932_vm2, %v3639_v7 }
  0x68   : > { %2994 = vmatmul.mubr.msk.bf16.vlgmr.msra.gmra.mrb[8].mxu1 %vm932_vm2, %v3639_v7  ;;  %2998 = vmatpush3.bf16.msra.mxu0 %v3222_v16  ;;  %v2796_v16 = vld [vmem:[%s4030_s5 + $0x2] ss:$0 sm:$0xff] }
  0x69   : > { %3006 = vmatpush3.bf16.msra.mxu1 %v3223_v17  ;;  %2999 = vmatprep.subr.bf16.mxu0 %v3356_v2 }
  0x6a   : > { %3007 = vmatprep.subr.bf16.mxu1 %v3356_v2  ;;  %3001 = vmatprep.mubr.msk.bf16.mxu0 %vm3357_vm1, %v3356_v2 }
  0x6b   : > { %3009 = vmatprep.mubr.msk.bf16.mxu1 %vm3357_vm1, %v3356_v2 }
  0x6c   : > { %3000 = vmatpush3.bf16.msra.mxu0 %v3224_v18 }
  0x6d   : > { %3008 = vmatpush3.bf16.msra.mxu1 %v3225_v19  ;;  %3013 = vmatprep.subr.bf16.mxu0 %v3356_v2  ;;  %v2797_v19 = vld [vmem:[%s4030_s5 + $0x3] ss:$0 sm:$0xff] }
  0x6e   : > { %3021 = vmatprep.subr.bf16.mxu1 %v3356_v2 }
  0x6f   : > { %3002 = vmatmul.mubr.msk.bf16.vlgmr.msra.gmra.mrb[12].mxu0 %vm932_vm2, %v3639_v7 }
  0x70   : > { %3010 = vmatmul.mubr.msk.bf16.vlgmr.msra.gmra.mrb[12].mxu1 %vm932_vm2, %v3639_v7  ;;  %3014 = vmatpush3.bf16.msra.mxu0 %v3226_v20 }
  0x71   : > { %3015 = vmatprep.subr.bf16.mxu0 %v3356_v2  ;;  %3017 = vmatprep.mubr.msk.bf16.mxu0 %vm3357_vm1, %v3356_v2 }
  0x72   : > { %3025 = vmatprep.mubr.msk.bf16.mxu1 %vm3357_vm1, %v3356_v2  ;;  %3022 = vmatpush3.bf16.msra.mxu1 %v3227_v21 }
  0x73   : > { %3023 = vmatprep.subr.bf16.mxu1 %v3356_v2 }
  0x74   : > { %3016 = vmatpush3.bf16.msra.mxu0 %v3228_v22 }
  0x75   : > { %3029 = vmatprep.subr.bf16.mxu0 %v3356_v2 }
  0x76   : > { %3024 = vmatpush3.bf16.msra.mxu1 %v3229_v23 }
  0x77   : > { %3018 = vmatmul.mubr.msk.bf16.vlgmr.msra.gmra.mrb[16].mxu0 %vm932_vm2, %v3639_v7  ;;  %3037 = vmatprep.subr.bf16.mxu1 %v3356_v2 }
  0x78   : > { %3033 = vmatprep.mubr.msk.bf16.mxu0 %vm3357_vm1, %v3356_v2  ;;  %3030 = vmatpush3.bf16.msra.mxu0 %v3230_v24 }
  0x79   : > { %3026 = vmatmul.mubr.msk.bf16.vlgmr.msra.gmra.mrb[16].mxu1 %vm932_vm2, %v3639_v7  ;;  %3031 = vmatprep.subr.bf16.mxu0 %v3356_v2 }
  0x7a   : > { %3038 = vmatpush3.bf16.msra.mxu1 %v3231_v25  ;;  %3041 = vmatprep.mubr.msk.bf16.mxu1 %vm3357_vm1, %v3356_v2 }
  0x7b   : > { %3039 = vmatprep.subr.bf16.mxu1 %v3356_v2 }
  0x7c   : > { %3032 = vmatpush3.bf16.msra.mxu0 %v3232_v26  ;;  %v2826_v26 = vld [vmem:[%s3574_s29] ss:$0 sm:$0xff] }
  0x7d   : > { %3045 = vmatprep.subr.bf16.mxu0 %v3356_v2 }
  0x7e   : > { %3040 = vmatpush3.bf16.msra.mxu1 %v3233_v27 }
  0x7f   : > { %3051 = vmatprep.subr.bf16.mxu1 %v3356_v2  ;;  %3034 = vmatmul.mubr.msk.bf16.vlgmr.msra.gmra.mrb[20].mxu0 %vm932_vm2, %v3639_v7 }
  0x80   : > { %3047 = vmatprep.mubr.msk.bf16.mxu0 %vm3357_vm1, %v3356_v2 }
  0x81   : > { %3042 = vmatmul.mubr.msk.bf16.vlgmr.msra.gmra.mrb[20].mxu1 %vm932_vm2, %v3639_v7 }
  0x82   : > { %3053 = vmatprep.mubr.msk.bf16.mxu1 %vm3357_vm1, %v3356_v2 }
 0x12a   : > { %v970_v28 = vpop.f32.mrb[0].mxu0 }
 0x12b   : > { %v2955_v29 = vpop.f32.mrb[1].mxu0  ;;  %v1022_v30 = vpop.f32.mrb[0].mxu1  ;;  %v971_v63 = vadd.f32 %v2794_v56, %v970_v28  ;;  %v2827_v28 = vld [vmem:[%s3574_s29 + $0x1] ss:$0 sm:$0xff] }
 0x12c   : > { %v973_v31 = vpop.f32.mrb[2].mxu0  ;;  %v2963_v32 = vpop.f32.mrb[1].mxu1  ;;  %v1023_v1 = vadd.f32 %v2795_v59, %v1022_v30 }
 0x12d   : > { %v2956_v33 = vpop.f32.mrb[3].mxu0  ;;  %v1025_v34 = vpop.f32.mrb[2].mxu1  ;;  %v1636_v11 = vpack.c.bf16 %v971_v63, %v971_v63 }
 0x12e   : > { %v2964_v35 = vpop.f32.mrb[3].mxu1  ;;  %v1637_v15 = vpack.c.bf16 %v1023_v1, %v1023_v1 }
 0x132   : > { %v1074_v36 = vpop.f32.mrb[4].mxu0 }
 0x133   : > { %v2971_v37 = vpop.f32.mrb[5].mxu0  ;;  %v1126_v38 = vpop.f32.mrb[4].mxu1  ;;  %v1075_v22 = vadd.f32 %v2796_v16, %v1074_v36 }
 0x134   : > { %v1077_v39 = vpop.f32.mrb[6].mxu0  ;;  %v2979_v40 = vpop.f32.mrb[5].mxu1  ;;  %v1127_v23 = vadd.f32 %v2797_v19, %v1126_v38 }
 0x135   : > { %v2972_v41 = vpop.f32.mrb[7].mxu0  ;;  %v1129_v42 = vpop.f32.mrb[6].mxu1  ;;  %v1638_v24 = vpack.c.bf16 %v1075_v22, %v1075_v22 }
 0x136   : > { %v2980_v43 = vpop.f32.mrb[7].mxu1  ;;  %v1639_v25 = vpack.c.bf16 %v1127_v23, %v1127_v23 }
 0x13a   : > { %v1222_v46 = vpop.f32.mrb[8].mxu0 }
 0x13b   : > { %v1223_v47 = vadd.f32 %v2810_v44, %v1222_v46  ;;  %v1274_v48 = vpop.f32.mrb[8].mxu1  ;;  %v2987_v49 = vpop.f32.mrb[9].mxu0 }
 0x13c   : > { %v1275_v50 = vadd.f32 %v2811_v45, %v1274_v48  ;;  %v1225_v51 = vpop.f32.mrb[10].mxu0  ;;  %v2995_v52 = vpop.f32.mrb[9].mxu1 }
 0x13d   : > { %v1640_v53 = vpack.c.bf16 %v1223_v47, %v1223_v47  ;;  %v2988_v54 = vpop.f32.mrb[11].mxu0  ;;  %v1277_v55 = vpop.f32.mrb[10].mxu1  ;;  %v2846_v51 = vld [vmem:[%s4033_s27] ss:$0 sm:$0xff] }
 0x13e   : > { %v1641_v57 = vpack.c.bf16 %v1275_v50, %v1275_v50  ;;  %v2996_v58 = vpop.f32.mrb[11].mxu1 }
 0x13f   : > { %v1649_v60 = vsel %vm1644_vm3, %v1640_v53, 0 }
 0x140   : > { %v1695_v61 = vsel %vm1644_vm3, %v1641_v57, 0  ;;  %3046 = vmatpush3.bf16.xpose.msra.mxu0 %v1649_v60 }
 0x141   : > { %3052 = vmatpush3.bf16.xpose.msra.mxu1 %v1695_v61  ;;  %3057 = vmatprep.subr.bf16.mxu0 %v3356_v2 }
 0x142   : > { %v1326_v3 = vpop.f32.mrb[12].mxu0  ;;  %3063 = vmatprep.subr.bf16.mxu1 %v3356_v2 }
 0x143   : > { %v1327_v4 = vadd.f32 %v2812_v62, %v1326_v3  ;;  %v1378_v5 = vpop.f32.mrb[12].mxu1  ;;  %v3003_v7 = vpop.f32.mrb[13].mxu0 }
 0x144   : > { %v1379_v8 = vadd.f32 %v2813_v0, %v1378_v5  ;;  %v1329_v9 = vpop.f32.mrb[14].mxu0  ;;  %v3011_v10 = vpop.f32.mrb[13].mxu1 }
 0x145   : > { %v1642_v12 = vpack.c.bf16 %v1327_v4, %v1327_v4  ;;  %v3004_v13 = vpop.f32.mrb[15].mxu0  ;;  %v1381_v14 = vpop.f32.mrb[14].mxu1 }
 0x146   : > { %v1643_v17 = vpack.c.bf16 %v1379_v8, %v1379_v8  ;;  %v3012_v18 = vpop.f32.mrb[15].mxu1 }
 0x147   : > { %v1741_v20 = vsel %vm1644_vm3, %v1642_v12, 0  ;;  %3048 = vmatmul.mubr.msk.bf16.vlgmr.msra.gmra.mrb[24].mxu0 %vm1644_vm3, %v1636_v11 }
 0x148   : > { %v1787_v21 = vsel %vm1644_vm3, %v1643_v17, 0  ;;  %3054 = vmatmul.mubr.msk.bf16.vlgmr.msra.gmra.mrb[24].mxu1 %vm1644_vm3, %v1637_v15  ;;  %3058 = vmatpush3.bf16.xpose.msra.mxu0 %v1741_v20 }
 0x149   : > { %3064 = vmatpush3.bf16.xpose.msra.mxu1 %v1787_v21  ;;  %3059 = vmatprep.mubr.msk.bf16.mxu0 %vm3357_vm1, %v3356_v2 }
 0x14a   : > { %3065 = vmatprep.mubr.msk.bf16.mxu1 %vm3357_vm1, %v3356_v2  ;;  %3069 = vmatprep.subr.bf16.mxu0 %v3356_v2  ;;  %v1474_v27 = vpop.f32.mrb[16].mxu0 }
 0x14b   : > { %3075 = vmatprep.subr.bf16.mxu1 %v3356_v2  ;;  %v1475_v29 = vadd.f32 %v2826_v26, %v1474_v27  ;;  %v3019_v30 = vpop.f32.mrb[17].mxu0 }
 0x14c   : > { %v1477_v31 = vpop.f32.mrb[18].mxu0  ;;  %v1526_v32 = vpop.f32.mrb[16].mxu1 }
 0x14d   : > { %v1892_v33 = vpack.c.bf16 %v1475_v29, %v1475_v29  ;;  %v3020_v34 = vpop.f32.mrb[19].mxu0  ;;  %v1527_v35 = vadd.f32 %v2827_v28, %v1526_v32  ;;  %v3027_v36 = vpop.f32.mrb[17].mxu1 }
 0x14e   : > { %v1529_v37 = vpop.f32.mrb[18].mxu1 }
 0x14f   : > { %3060 = vmatmul.mubr.msk.bf16.vlgmr.msra.gmra.mrb[28].mxu0 %vm1644_vm3, %v1638_v24  ;;  %v1901_v38 = vsel %vm1899_vm4, %v1892_v33, 0  ;;  %v1893_v39 = vpack.c.bf16 %v1527_v35, %v1527_v35  ;;  %v3028_v40 = vpop.f32.mrb[19].mxu1 }
 0x150   : > { %3066 = vmatmul.mubr.msk.bf16.vlgmr.msra.gmra.mrb[28].mxu1 %vm1644_vm3, %v1639_v25  ;;  %3071 = vmatprep.mubr.msk.bf16.mxu0 %vm3357_vm1, %v3356_v2 }
 0x151   : > { %3077 = vmatprep.mubr.msk.bf16.mxu1 %vm3357_vm1, %v3356_v2  ;;  %3070 = vmatpush3.bf16.msra.mxu0 %v1901_v38  ;;  %v1947_v41 = vsel %vm1899_vm4, %v1893_v39, 0  ;;  %v2828_v39 = vld [vmem:[%s3574_s29 + $0x2] ss:$0 sm:$0xff] }
 0x152   : > { %3081 = vmatprep.subr.bf16.mxu0 %v3356_v2  ;;  %3076 = vmatpush3.bf16.msra.mxu1 %v1947_v41  ;;  %v3765_v42 = vpop.f32.mrb[20].mxu0 }
 0x153   : > { %3087 = vmatprep.subr.bf16.mxu1 %v3356_v2  ;;  %v3035_v44 = vpop.f32.mrb[21].mxu0  ;;  %v1579_v40 = vadd.f32 %v2828_v39, %v3765_v42 }
 0x154   : > { %v3767_v43 = vpop.f32.mrb[20].mxu1  ;;  %v1581_v46 = vpop.f32.mrb[22].mxu0  ;;  %v2829_v44 = vld [vmem:[%s3574_s29 + $0x3] ss:$0 sm:$0xff] }
 0x155   : > { %v3043_v45 = vpop.f32.mrb[21].mxu1  ;;  %v3036_v48 = vpop.f32.mrb[23].mxu0  ;;  %v1894_v46 = vpack.c.bf16 %v1579_v40, %v1579_v40 }
 0x156   : > { %v1633_v47 = vpop.f32.mrb[22].mxu1 }
 0x157   : > { %v3044_v49 = vpop.f32.mrb[23].mxu1  ;;  %v1631_v47 = vadd.f32 %v2829_v44, %v3767_v43  ;;  %v2085_v43 = vld [vmem:[%s3580_s4] sm:$0xf] }
 0x21a   : > { %v1685_v50 = vpop.f32.mrb[24].mxu0 }
 0x21b   : > { %v1829_v52 = vmul.f32 0.35355338, %v1685_v50  ;;  %v1731_v53 = vpop.f32.mrb[24].mxu1  ;;  %v3049_v54 = vpop.f32.mrb[25].mxu0 }
 0x21c   : > { %v1830_v55 = vmul.f32 0.35355338, %v1731_v53  ;;  %v3055_v56 = vpop.f32.mrb[25].mxu1  ;;  %v1688_v57 = vpop.f32.mrb[26].mxu0  ;;  %v1895_v53 = vpack.c.bf16 %v1631_v47, %v1631_v47 }
 0x21d   : > { %v1734_v58 = vpop.f32.mrb[26].mxu1  ;;  %v3050_v59 = vpop.f32.mrb[27].mxu0  ;;  %v1840_v60 = vadd.f32 %v2846_v51, %v1829_v52  ;;  %v1993_v52 = vsel %vm1899_vm4, %v1894_v46, 0 }
 0x21e   : > { %v3056_v61 = vpop.f32.mrb[27].mxu1  ;;  %v1841_v63 = vadd.f32 %v2846_v51, %v1830_v55  ;;  %v2039_v56 = vsel %vm1899_vm4, %v1895_v53, 0  ;;  %v2093_v59 = vsel %vm1899_vm4, %v2085_v43, 0 }
 0x21f   : > { %v1844_v62 = vsel %vm1644_vm3, %v1840_v60, -inf }
 0x220   : > { %1845 = vmax.xlane.f32.xlu0 %v1844_v62  ;;  %v1847_v5 = vsel %vm1644_vm3, %v1841_v63, -inf }
 0x222   : > { %v1777_v0 = vpop.f32.mrb[28].mxu0 }
 0x223   : > { %v1831_v1 = vmul.f32 0.35355338, %v1777_v0  ;;  %v1823_v3 = vpop.f32.mrb[28].mxu1  ;;  %v3061_v4 = vpop.f32.mrb[29].mxu0 }
 0x224   : > { %v1832_v7 = vmul.f32 0.35355338, %v1823_v3  ;;  %v3067_v8 = vpop.f32.mrb[29].mxu1  ;;  %1848 = vmax.xlane.f32.xlu0 %v1847_v5  ;;  %v1780_v9 = vpop.f32.mrb[30].mxu0 }
 0x225   : > { %v1826_v10 = vpop.f32.mrb[30].mxu1  ;;  %v3062_v11 = vpop.f32.mrb[31].mxu0  ;;  %v1842_v12 = vadd.f32 %v2846_v51, %v1831_v1  ;;  %v2087_v1 = vld [vmem:[%s3580_s4 + $0x8] sm:$0xf]  ;;  %v2088_v9 = vld [vmem:[%s3580_s4 + $0xc] sm:$0xf] }
 0x226   : > { %v3068_v13 = vpop.f32.mrb[31].mxu1  ;;  %v1843_v15 = vadd.f32 %v2846_v51, %v1832_v7  ;;  %v2185_v7 = vsel %vm1899_vm4, %v2087_v1, 0 }
 0x227   : > { %v1850_v14 = vsel %vm1644_vm3, %v1842_v12, -inf }
 0x228   : > { %1851 = vmax.xlane.f32.xlu1 %v1850_v14  ;;  %v1853_v16 = vsel %vm1644_vm3, %v1843_v15, -inf  ;;  %v2231_v14 = vsel %vm1899_vm4, %v2088_v9, 0 }
 0x22c   : > { %1854 = vmax.xlane.f32.xlu1 %v1853_v16 }
 0x2ad   : > { %v1846_v17 = vpop.xlane.xlu0 %1845 }
 0x2ae   : > { %v1856_v18 = vsub.f32 %v1840_v60, %v1846_v17 }
 0x2b0   : > { %v1860_v19 = vmul.f32 1.442695, %v1856_v18 }
 0x2b1   : > { %v1849_v20 = vpop.xlane.xlu0 %1848 }
 0x2b2   : > { %3240 = vpow2.f32 %v1860_v19  ;;  %v1857_v21 = vsub.f32 %v1841_v63, %v1849_v20  ;;  %v2086_v63 = vld [vmem:[%s3580_s4 + $0x4] sm:$0xf] }
 0x2b3   : > { %v2139_v0 = vsel %vm1899_vm4, %v2086_v63, 0 }
 0x2b4   : > { %v1862_v22 = vmul.f32 1.442695, %v1857_v21 }
 0x2b5   : > { %v1852_v23 = vpop.xlane.xlu1 %1851 }
 0x2b6   : > { %3242 = vpow2.f32 %v1862_v22  ;;  %v1858_v24 = vsub.f32 %v1842_v12, %v1852_v23 }
 0x2b8   : > { %v1864_v25 = vmul.f32 1.442695, %v1858_v24 }
 0x2b9   : > { %v1855_v26 = vpop.xlane.xlu1 %1854 }
 0x2ba   : > { %3244 = vpow2.f32 %v1864_v25  ;;  %v1859_v27 = vsub.f32 %v1843_v15, %v1855_v26 }
 0x2bc   : > { %v3241_v28 = vpop.eup %3240  ;;  %v1866_v29 = vmul.f32 1.442695, %v1859_v27 }
 0x2bd   : > { %v1868_v30 = vsel %vm1644_vm3, %v3241_v28, 0.0 }
 0x2be   : > { %3246 = vpow2.f32 %v1866_v29  ;;  %1869 = vadd.xlane.f32.xlu0 %v1868_v30 }
 0x2c0   : > { %v3243_v31 = vpop.eup %3242 }
 0x2c1   : > { %v1871_v32 = vsel %vm1644_vm3, %v3243_v31, 0.0 }
 0x2c2   : > { %1872 = vadd.xlane.f32.xlu1 %v1871_v32 }
 0x2c4   : > { %v3245_v33 = vpop.eup %3244 }
 0x2c5   : > { %v1874_v34 = vsel %vm1644_vm3, %v3245_v33, 0.0 }
 0x2c6   : > { %1875 = vadd.xlane.f32.xlu0 %v1874_v34 }
 0x2c8   : > { %v3247_v35 = vpop.eup %3246 }
 0x2c9   : > { %v1877_v36 = vsel %vm1644_vm3, %v3247_v35, 0.0 }
 0x2ca   : > { %1878 = vadd.xlane.f32.xlu1 %v1877_v36 }
 0x34b   : > { %v1870_v37 = vpop.xlane.xlu0 %1869 }
 0x34c   : > { %3248 = vrcp.f32 %v1870_v37 }
 0x34f   : > { %v1873_v38 = vpop.xlane.xlu1 %1872 }
 0x350   : > { %3250 = vrcp.f32 %v1873_v38 }
 0x353   : > { %v1876_v41 = vpop.xlane.xlu0 %1875 }
 0x354   : > { %3252 = vrcp.f32 %v1876_v41 }
 0x356   : > { %v3249_v45 = vpop.eup %3248 }
 0x357   : > { %v1884_v48 = vmul.f32 %v3249_v45, %v3241_v28  ;;  %v1879_v49 = vpop.xlane.xlu1 %1878 }
 0x358   : > { %3254 = vrcp.f32 %v1879_v49 }
 0x359   : > { %v1888_v50 = vpack.c.bf16 %v1884_v48, %v1884_v48  ;;  %v2855_v48 = vld [vmem:[%s4035_s21] ss:$0 sm:$0xff] }
 0x35a   : > { %v3251_v51 = vpop.eup %3250 }
 0x35b   : > { %v1885_v54 = vmul.f32 %v3251_v51, %v3243_v31  ;;  %3072 = vmatmul.mubr.msk.bf16.vlgmr.msra.gmra.mrb[32].mxu0 %vm1644_vm3, %v1888_v50 }
 0x35c   : > { %3082 = vmatpush3.bf16.msra.mxu0 %v1993_v52  ;;  %3083 = vmatprep.mubr.msk.bf16.mxu0 %vm3357_vm1, %v3356_v2 }
 0x35d   : > { %v1889_v42 = vpack.c.bf16 %v1885_v54, %v1885_v54  ;;  %3093 = vmatprep.subr.bf16.mxu0 %v3356_v2 }
 0x35e   : > { %v3253_v55 = vpop.eup %3252 }
 0x35f   : > { %v1886_v57 = vmul.f32 %v3253_v55, %v3245_v33  ;;  %3078 = vmatmul.mubr.msk.bf16.vlgmr.msra.gmra.mrb[32].mxu1 %vm1644_vm3, %v1889_v42 }
 0x360   : > { %3088 = vmatpush3.bf16.msra.mxu1 %v2039_v56  ;;  %3089 = vmatprep.mubr.msk.bf16.mxu1 %vm3357_vm1, %v3356_v2 }
 0x361   : > { %v1890_v58 = vpack.c.bf16 %v1886_v57, %v1886_v57  ;;  %3099 = vmatprep.subr.bf16.mxu1 %v3356_v2 }
 0x362   : > { %v3255_v60 = vpop.eup %3254 }
 0x363   : > { %v1887_v61 = vmul.f32 %v3255_v60, %v3247_v35  ;;  %3084 = vmatmul.mubr.msk.bf16.vlgmr.msra.gmra.mrb[36].mxu0 %vm1644_vm3, %v1890_v58  ;;  %v3235_v60 = vld [vmem:[%s3597_s6 + $0x8] sm:$0xff]  }
 0x364   : > { %3094 = vmatpush3.bf16.msra.mxu0 %v2093_v59  ;;  %3095 = vmatprep.mubr.msk.bf16.mxu0 %vm3357_vm1, %v3356_v2  ;;  %v3234_v59 = vld [vmem:[%s3597_s6] sm:$0xff]  }
 0x365   : > { %v1891_v62 = vpack.c.bf16 %v1887_v61, %v1887_v61  ;;  %3105 = vmatprep.subr.bf16.mxu0 %v3356_v2  ;;  %v3237_v61 = vld [vmem:[%s3611_s10 + $0x8] sm:$0xff]  }
 0x367   : > { %3090 = vmatmul.mubr.msk.bf16.vlgmr.msra.gmra.mrb[36].mxu1 %vm1644_vm3, %v1891_v62 }
 0x368   : > { %3101 = vmatprep.mubr.msk.bf16.mxu1 %vm3357_vm1, %v3356_v2  ;;  %3100 = vmatpush3.bf16.msra.mxu1 %v2139_v0 }
 0x369   : > { %3111 = vmatprep.subr.bf16.mxu1 %v3356_v2 }
 0x42e   : > { %v1937_v3 = vpop.f32.mrb[32].mxu0 }
 0x42f   : > { %v2081_v4 = vpack.c.bf16 %v1937_v3, %v1937_v3  ;;  %v3073_v5 = vpop.f32.mrb[33].mxu0  ;;  %v2856_v3 = vld [vmem:[%s4037_s20] ss:$0 sm:$0xff] }
 0x430   : > { %v1940_v8 = vpop.f32.mrb[34].mxu0  ;;  %v2857_v5 = vld [vmem:[%s4039_s30] ss:$0 sm:$0xff] }
 0x431   : > { %v3074_v10 = vpop.f32.mrb[35].mxu0  ;;  %3096 = vmatmul.mubr.msk.bf16.vlgmr.msra.gmra.mrb[40].mxu0 %vm1644_vm3, %v2081_v4 }
 0x432   : > { %v1983_v11 = vpop.f32.mrb[32].mxu1  ;;  %3106 = vmatpush3.bf16.msra.mxu0 %v2185_v7  ;;  %3107 = vmatprep.mubr.msk.bf16.mxu0 %vm3357_vm1, %v3356_v2  ;;  %v3238_v10 = vld [vmem:[%s3611_s10 + $0x10] sm:$0xff]  }
 0x433   : > { %v2082_v12 = vpack.c.bf16 %v1983_v11, %v1983_v11  ;;  %v3079_v13 = vpop.f32.mrb[33].mxu1  ;;  %3117 = vmatprep.subr.bf16.mxu0 %v3356_v2  ;;  %v3239_v11 = vld [vmem:[%s3611_s10 + $0x18] sm:$0xff]  }
 0x434   : > { %v1986_v15 = vpop.f32.mrb[34].mxu1 }
 0x435   : > { %v3080_v16 = vpop.f32.mrb[35].mxu1  ;;  %3102 = vmatmul.mubr.msk.bf16.vlgmr.msra.gmra.mrb[40].mxu1 %vm1644_vm3, %v2082_v12  ;;  %v2858_v12 = vld [vmem:[%s851_s7] ss:$0 sm:$0xff] }
 0x436   : > { %v2029_v17 = vpop.f32.mrb[36].mxu0  ;;  %3112 = vmatpush3.bf16.msra.mxu1 %v2231_v14  ;;  %3113 = vmatprep.mubr.msk.bf16.mxu1 %vm3357_vm1, %v3356_v2 }
 0x437   : > { %v2083_v18 = vpack.c.bf16 %v2029_v17, %v2029_v17  ;;  %v3085_v19 = vpop.f32.mrb[37].mxu0  ;;  %3125 = vmatprep.subr.bf16.mxu1 %v3356_v2 }
 0x438   : > { %v2032_v20 = vpop.f32.mrb[38].mxu0 }
 0x439   : > { %v3086_v21 = vpop.f32.mrb[39].mxu0  ;;  %3108 = vmatmul.mubr.msk.bf16.vlgmr.msra.gmra.mrb[44].mxu0 %vm1644_vm3, %v2083_v18 }
 0x43a   : > { %v2075_v22 = vpop.f32.mrb[36].mxu1  ;;  %3121 = vmatprep.mubr.msk.bf16.mxu0 %vm3357_vm1, %v3356_v2  ;;  %3118 = vmatpush3.bf16.msra.mxu0 %v3234_v59 }
 0x43b   : > { %v2084_v23 = vpack.c.bf16 %v2075_v22, %v2075_v22  ;;  %v3091_v24 = vpop.f32.mrb[37].mxu1  ;;  %3119 = vmatprep.subr.bf16.mxu0 %v3356_v2 }
 0x43c   : > { %v2078_v25 = vpop.f32.mrb[38].mxu1 }
 0x43d   : > { %v3092_v26 = vpop.f32.mrb[39].mxu1  ;;  %3114 = vmatmul.mubr.msk.bf16.vlgmr.msra.gmra.mrb[44].mxu1 %vm1644_vm3, %v2084_v23 }
 0x43e   : > { %3133 = vmatprep.mubr.msk.bf16.mxu1 %vm3357_vm1, %v3356_v2  ;;  %3120 = vmatpush3.bf16.msra.mxu0 %v3235_v60 }
 0x504   : > { %v2129_v27 = vpop.f32.mrb[40].mxu0 }
 0x505   : > { %v3097_v28 = vpop.f32.mrb[41].mxu0  ;;  %v2273_v32 = vsel %vm932_vm2, %v2129_v27, 0.0 }
 0x506   : > { %v2132_v29 = vpop.f32.mrb[42].mxu0 }
 0x507   : > { %v3098_v30 = vpop.f32.mrb[43].mxu0 }
 0x508   : > { %v2175_v31 = vpop.f32.mrb[40].mxu1 }
 0x509   : > { %v2274_v33 = vsel %vm932_vm2, %v2175_v31, 0.0  ;;  %v3103_v34 = vpop.f32.mrb[41].mxu1 }
 0x50a   : > { %v2275_v35 = vadd.f32 %v2274_v33, %v2273_v32  ;;  %v2178_v36 = vpop.f32.mrb[42].mxu1 }
 0x50b   : > { %v3104_v37 = vpop.f32.mrb[43].mxu1  ;;  %v2868_v36 = vld [vmem:[%s862_s16] ss:$0 sm:$0xff] }
 0x50c   : > { %v2221_v38 = vpop.f32.mrb[44].mxu0 }
 0x50d   : > { %v2276_v39 = vsel %vm932_vm2, %v2221_v38, 0.0  ;;  %v3109_v40 = vpop.f32.mrb[45].mxu0  ;;  %v2869_v38 = vld [vmem:[%s865_s11] ss:$0 sm:$0xff] }
 0x50e   : > { %v2277_v41 = vadd.f32 %v2276_v39, %v2275_v35  ;;  %v2224_v44 = vpop.f32.mrb[46].mxu0 }
 0x50f   : > { %v3110_v45 = vpop.f32.mrb[47].mxu0 }
 0x510   : > { %v2267_v46 = vpop.f32.mrb[44].mxu1 }
 0x511   : > { %v2278_v47 = vsel %vm932_vm2, %v2267_v46, 0.0  ;;  %v3115_v49 = vpop.f32.mrb[45].mxu1 }
 0x512   : > { %v2279_v50 = vadd.f32 %v2278_v47, %v2277_v41  ;;  %v2270_v51 = vpop.f32.mrb[46].mxu1 }
 0x513   : > { %v3116_v52 = vpop.f32.mrb[47].mxu1 }
 0x514   : > { %v2287_v53 = vadd.f32 %v2855_v48, %v2279_v50 }
 0x516   : > { %v2288_v54 = vadd.f32 %v2287_v53, %v3635_v6  ;;  %v3236_v6 = vld [vmem:[%s3611_s10] sm:$0xff]  }
 0x517   : > { %3126 = vmatpush3.bf16.msra.mxu1 %v3236_v6 }
 0x518   : > { %v2289_v42 = vsel %vm932_vm2, %v2288_v54, 0.0  ;;  %3127 = vmatprep.subr.bf16.mxu1 %v3356_v2 }
 0x519   : > { %2290 = vadd.xlane.f32.xlu0 %v2289_v42 }
 0x51b   : > { %3128 = vmatpush3.bf16.msra.mxu1 %v3237_v61 }
 0x51c   : > { %3129 = vmatprep.subr.bf16.mxu1 %v3356_v2 }
 0x51f   : > { %3130 = vmatpush3.bf16.msra.mxu1 %v3238_v10 }
 0x520   : > { %3131 = vmatprep.subr.bf16.mxu1 %v3356_v2  ;;  %v2862_v2 = vld [vmem:[%s859_s9] ss:$0 sm:$0xff] }
 0x523   : > { %3132 = vmatpush3.bf16.msra.mxu1 %v3239_v11 }
 0x5a6   : > { %v2291_v55 = vpop.xlane.xlu0 %2290 }
 0x5a7   : > { %v2293_v43 = vmul.f32 0.03125, %v2291_v55 }
 0x5a9   : > { %v2294_v56 = vsub.f32 %v2288_v54, %v2293_v43 }
 0x5ab   : > { %v2295_v57 = vmul.f32 %v2294_v56, %v2294_v56 }
 0x5ad   : > { %v2296_v58 = vsel %vm932_vm2, %v2295_v57, 0.0 }
 0x5ae   : > { %2297 = vadd.xlane.f32.xlu1 %v2296_v58 }
 0x63b   : > { %v2298_v62 = vpop.xlane.xlu1 %2297 }
 0x63c   : > { %v2299_v63 = vmul.f32 0.03125, %v2298_v62 }
 0x63e   : > { %v2300_v0 = vadd.f32 1e-05, %v2299_v63 }
 0x640   : > { %3256 = vrsqrt.f32 %v2300_v0 }
 0x64a   : > { %v3257_v1 = vpop.eup %3256 }
 0x64b   : > { %v2302_v4 = vmul.f32 %v3257_v1, %v2294_v56 }
 0x64d   : > { %v2310_v7 = vmul.f32 %v2856_v3, %v2302_v4 }
 0x64f   : > { %v2318_v8 = vadd.f32 %v2857_v5, %v2310_v7 }
 0x651   : > { %v2319_v9 = vpack.c.bf16 %v2318_v8, %v2318_v8 }
 0x653   : > { %3122 = vmatmul.mubr.msk.bf16.vlgmr.msra.gmra.mrb[48].mxu0 %vm932_vm2, %v2319_v9 }
 0x726   : > { %v2380_v13 = vpop.f32.mrb[48].mxu0 }
 0x727   : > { %v2381_v14 = vadd.f32 %v2858_v12, %v2380_v13  ;;  %v3123_v15 = vpop.f32.mrb[49].mxu0 }
 0x728   : > { %v2383_v16 = vpop.f32.mrb[50].mxu0 }
 0x729   : > { %v2386_v17 = vmax.f32 %v2381_v14, 0.0  ;;  %v3124_v18 = vpop.f32.mrb[51].mxu0 }
 0x72b   : > { %v2387_v19 = vpack.c.bf16 %v2386_v17, %v2386_v17 }
 0x72d   : > { %3134 = vmatmul.mubr.msk.bf16.vlgmr.msra.gmra.mrb[48].mxu1 %vm2427_vm5, %v2387_v19 }
 0x800   : > { %v2465_v20 = vpop.f32.mrb[48].mxu1 }
 0x801   : > { %v2466_v21 = vadd.f32 %v2862_v2, %v2465_v20  ;;  %v3135_v22 = vpop.f32.mrb[49].mxu1 }
 0x802   : > { %v2468_v23 = vpop.f32.mrb[50].mxu1 }
 0x803   : > { %v3136_v24 = vpop.f32.mrb[51].mxu1  ;;  %v2471_v25 = vadd.f32 %v2466_v21, %v2318_v8 }
 0x805   : > { %v2472_v26 = vsel %vm932_vm2, %v2471_v25, 0.0 }
 0x806   : > { %2473 = vadd.xlane.f32.xlu0 %v2472_v26 }
 0x893   : > { %v2474_v27 = vpop.xlane.xlu0 %2473 }
 0x894   : > { %v2475_v28 = vmul.f32 0.03125, %v2474_v27 }
 0x896   : > { %v2476_v29 = vsub.f32 %v2471_v25, %v2475_v28 }
 0x898   : > { %v2477_v30 = vmul.f32 %v2476_v29, %v2476_v29 }
 0x89a   : > { %v2478_v31 = vsel %vm932_vm2, %v2477_v30, 0.0 }
 0x89b   : > { %2479 = vadd.xlane.f32.xlu1 %v2478_v31 }
 0x928   : > { %v2480_v32 = vpop.xlane.xlu1 %2479 }
 0x929   : > { %v2481_v33 = vmul.f32 0.03125, %v2480_v32 }
 0x92b   : > { %v2482_v34 = vadd.f32 1e-05, %v2481_v33 }
 0x92d   : > { %3258 = vrsqrt.f32 %v2482_v34 }
 0x937   : > { %v3259_v35 = vpop.eup %3258 }
 0x938   : > { %v2484_v37 = vmul.f32 %v3259_v35, %v2476_v29  ;;  %2505 = sbr.rel (%p2870_p1) target bundleno = 2367 (0x93f), region = 100 }
 0x93a   : > { %v2492_v39 = vmul.f32 %v2868_v36, %v2484_v37 }
 0x93c   : > { %v2500_v40 = vadd.f32 %v2869_v38, %v2492_v39 }
 0x93e   : > { %2501 = vst.msk [vmem:[#allocation2] sm:$0xff] %vm932_vm2, %v2500_v40  ;;  %2506 = vst.msk [vmem:[%s795_s3] sm:$0xff] (!%p2870_p1), %vm932_vm2, %v2500_v40 }
 0x93f PF: > { %s4044_s27 = sld [smem:[#allocation10_spill]]  ;;  %s4045_s16 = sld [smem:[#allocation7_spill]] }
 0x940   : > { %s4047_s11 = sld [smem:[#allocation38_spill]]  ;;  %s2521_s6 = sshll.u32 %s795_s3, 4  ;;  %s2522_s6 = int_to_ptr.vmem [resolvable:$true] %s2521_s6 }
 0x941   : > { %s3260_s20 = scalar_lea.vmem %s2522_s6, 128  ;;  %s3358_s22 = smov [#allocation3]  }
 0x942   : > { %p3261_p2 = scmp.ne.s32.totalorder %s2522_s6, %s3260_s20  ;;  %s3264_s25 = sshll.u32 %s3358_s22, 4  ;;  %s3265_s25 = int_to_ptr.vmem [resolvable:$false] %s3264_s25 }
 0x943   : > { %s3266_s1 = scalar_lea.vmem %s3265_s25, 256  ;;  %p3267_p6 = scmp.lt.s32.totalorder %s2522_s6, %s3265_s25 }
 0x944   : > { %p3262_p4 = pnand %p3261_p2, %p3503_p3  ;;  %p3268_p7 = scmp.lt.s32.totalorder %s3266_s1, %s3260_s20 }
 0x945   : > { %s2872_s29 = sshll.u32 %s4044_s27, 7  ;;  %s4048_s24 = sand.u32 1, %s4045_s16  }
 0x946   : > { %s3890_s21 = scalar_lea.hbm %s4047_s11, %s2872_s29  ;;  %s2508_s14 = scalar_lea.sflag [#allocation4], %s4048_s24 }
 0x947   : > { %p3263_p5 = pneg %p3262_p4  ;;  %p3269_p8 = por %p3268_p7, %p3267_p6 }
 0x949   : > { %p3270_p10 = pnand %p3269_p8, %p3263_p5 }
 0x94b   : > { %3273 = shalt.err (!%p3270_p10)
}
 0x94c   : > { %s3274_s19 = scalar_lea.hbm %s3890_s21, 128  ;;  %s3278_s0 = scalar_lea.hbm %s4047_s11, 256 }
 0x94d   : > { %p3275_p11 = scmp.ne.s32.totalorder %s3890_s21, %s3274_s19  ;;  %p3279_p0 = scmp.lt.u32.totalorder %s3890_s21, %s4047_s11 }
 0x94e   : > { %p3280_p1 = scmp.lt.u32.totalorder %s3278_s0, %s3274_s19  ;;  %p3282_p4 = scmp.lt.u32.totalorder %s3274_s19, %s3890_s21 }
 0x94f   : > { %p3276_p12 = pnand %p3275_p11, %p3503_p3 }
 0x950   : > { %p3281_p2 = por %p3280_p1, %p3279_p0 }
 0x951   : > { %p3277_p13 = pneg %p3276_p12 }
 0x952   : > { %p3283_p5 = por %p3282_p4, %p3281_p2 }
 0x954   : > { %p3284_p6 = pnand %p3283_p5, %p3277_p13 }
 0x956   : > { %3287 = shalt.err (!%p3284_p6)
}
 0x957   : > { %3137 = dma.vmem_to_hbm [thread:$0]  (%p3503_p3), %s2522_s6, 128, %s3890_s21, %s2508_s14  }
 0x958 PF: > { %s4049_s23 = sld [smem:[#allocation13_spill]]  ;;  %s4050_s5 = sld [smem:[#allocation6_spill]] }
 0x95e   : > { %p3143_p7 = scmp.ge.s32.totalorder %s4049_s23, 2  ;;  %s2533_s9 = sand.u32 1, %s4050_s5  }
 0x95f   : > { %s2534_s10 = scalar_lea.sflag [#allocation4], %s2533_s9 }
 0x960   : > { %p3140_p8 = pnand %p3143_p7, %p3513_p9 }
 0x962   : > { %3321 = dma.done.wait (!%p3140_p8), %s2534_s10, 128  }
 0x963   : > { %3323 = vsyncadd (!%p3140_p8), %s2534_s10, 4294967168  ;;  %s31_s20 = sadd.s32 1, %s4049_s23   ;;  %s4052_s27 = sld [smem:[#allocation7_spill]] }
 0x964   : > { %p28_p10 = scmp.ge.s32.totalorder %s31_s20, 6   ;;  %s4053_s28 = sld [smem:[#allocation8_spill]] }
 0x965   : > { %s4054_s29 = sld [smem:[#allocation18_spill]]  ;;  %s4055_s30 = sld [smem:[#allocation11_spill]] }
 0x966   : > { %s4056_s0 = sld [smem:[#allocation12_spill]]  ;;  %s4057_s19 = sld [smem:[#allocation14_spill]] }
 0x967   : > { %s4058_s1 = sld [smem:[#allocation16_spill]]  ;;  %30 = sbr.rel (!%p28_p10) target bundleno = 24 (0x18), region = 186 }
 0x96e   :  { %2539 = vsyncpa [#allocation4], 1 }
 0x96f   :  { %2541 = vsyncpa [#allocation4 + $0x1], 1 }

</bundles_post_ra>
